<compile_context>
chip_gen: v5e
topology: v5e:2x2
jax: 0.10.0
libtpu: 0.0.40
codegen_flags: <defaults>
</compile_context>

<pallas_src>
import functools

import jax
import jax.numpy as jnp
from jax.experimental import pallas as pl
from jax.experimental.pallas import tpu as pltpu


# --------------------------------------------------------------------------- #
# Kernels
# --------------------------------------------------------------------------- #
def _lane_interleave(x_ref, e_ref, i, *, gain, c_out, compute_dtype, precision):
    """b_i[k*th + h, w*s + j] = x[(i*s + j)*c_out + k, h, w]  (f32 accumulator)."""
    s = gain
    _, _, th, wt = x_ref.shape
    acc = None
    for j in range(s):
        c0 = (i * s + j) * c_out
        # Slice straight from the ref (no whole-block load) and flatten the
        # leading dims onto sublanes (layout-trivial: th is a sublane multiple).
        slab = x_ref[0, c0:c0 + c_out].reshape(c_out * th, wt)
        if slab.dtype != compute_dtype:
            slab = slab.astype(compute_dtype)
        part = jnp.dot(slab, e_ref[j],
                       preferred_element_type=jnp.float32,
                       precision=precision)
        acc = part if acc is None else acc + part
    return acc  # (c_out*th, wt*s), float32


def _defocus_kernel_strided(e_ref, x_ref, o_ref, *, gain, c_out,
                            compute_dtype, precision):
    s = gain
    _, _, th, wt = x_ref.shape
    for i in range(s):
        b_i = _lane_interleave(x_ref, e_ref, i, gain=s, c_out=c_out,
                               compute_dtype=compute_dtype, precision=precision)
        # Row h of b_i goes to output row h*s + i: dense lanes, sublane stride s.
        o_ref[0, :, pl.ds(i, th, stride=s), :] = (
            b_i.reshape(c_out, th, wt * s).astype(o_ref.dtype))


def _defocus_kernel_rowscatter(e_ref, x_ref, o_ref, *, gain, c_out,
                               compute_dtype, precision):
    # Fallback only (small tiles): sublane interleave via a 0/1 row-scatter
    # matmul.  Never used when sublane-strided stores lower.
    s = gain
    _, _, th, wt = x_ref.shape
    r_in, r_out = c_out * th, c_out * th * s
    r_idx = jax.lax.broadcasted_iota(jnp.int32, (r_out, r_in), 0)
    c_idx = jax.lax.broadcasted_iota(jnp.int32, (r_out, r_in), 1)
    out = jnp.zeros((r_out, wt * s), jnp.float32)
    for i in range(s):
        b_i = _lane_interleave(x_ref, e_ref, i, gain=s, c_out=c_out,
                               compute_dtype=compute_dtype, precision=precision)
        p_i = (r_idx == s * c_idx + i).astype(jnp.float32)
        out = out + jnp.dot(p_i, b_i, preferred_element_type=jnp.float32,
                            precision=jax.lax.Precision.HIGHEST)
    o_ref[0] = out.reshape(c_out, th * s, wt * s).astype(o_ref.dtype)


# --------------------------------------------------------------------------- #
# Tiling helpers
# --------------------------------------------------------------------------- #
def _sublane_quantum(itemsize):
    return 8 * max(1, 4 // itemsize)          # 8 f32, 16 bf16/f16, 32 int8/fp8


def _pick_w_tile(W, itemsize):
    """Divisor of W, preferably a multiple of 128 near the MXU contraction dim."""
    pref = 256 if itemsize <= 2 else 128
    if W <= pref:
        return W
    cands = [t for t in range(128, min(W, 512) + 1, 128) if W % t == 0]
    if not cands:
        return W                              # awkward W: single W block
    small = [t for t in cands if t <= pref]
    return max(small) if small else min(cands)


def _pick_h_tile(H, per_row_bytes, itemsize, budget_bytes):
    """Largest dtype-aligned divisor of H whose pipeline footprint fits."""
    q = _sublane_quantum(itemsize)
    legal = [t for t in range(q, H + 1, q) if H % t == 0]
    if H not in legal:
        legal.append(H)
    fitting = [t for t in legal if t * per_row_bytes <= budget_bytes]
    return max(fitting) if fitting else min(legal)


def _scatter_matrices(gain, w_tile, dtype):
    """E[j, w, w*s + j] = 1  -- lane-scatter matrices, shape (s, Wt, Wt*s)."""
    s = gain
    j = jnp.arange(s)[:, None, None]
    w = jnp.arange(w_tile)[None, :, None]
    l = jnp.arange(w_tile * s)[None, None, :]
    return (l == w * s + j).astype(dtype)


# --------------------------------------------------------------------------- #
# Wrapper
# --------------------------------------------------------------------------- #
def defocus_forward(x, gain=2, vmem_budget_bytes=12 << 20):
    """x: (N, C, H, W) -> (N, C // gain**2, H*gain, W*gain)."""
    N, C, H, W = x.shape
    s = gain
    assert C % (s * s) == 0, "C must be divisible by gain**2"
    c_out = C // (s * s)
    itemsize = x.dtype.itemsize

    # bf16: single native MXU pass (exact for a 0/1 scatter).
    # Everything else (f32, f16, small ints): f32 operands + HIGHEST (exact).
    if x.dtype == jnp.bfloat16:
        compute_dtype, precision = jnp.bfloat16, None
    else:
        compute_dtype, precision = jnp.float32, jax.lax.Precision.HIGHEST

    w_tile = _pick_w_tile(W, itemsize)
    # Footprint per h-row: 2x input + 2x output blocks (double-buffered) plus
    # ~f32 in-kernel intermediates (b_i accumulator + store temp).
    per_row_bytes = C * w_tile * (4 * itemsize + 8)
    h_tile = _pick_h_tile(H, per_row_bytes, itemsize, vmem_budget_bytes)

    e = _scatter_matrices(s, w_tile, compute_dtype)

    def build(kernel_fn, h_t):
        kern = functools.partial(kernel_fn, gain=s, c_out=c_out,
                                 compute_dtype=compute_dtype,
                                 precision=precision)
        return pl.pallas_call(
            kern,
            out_shape=jax.ShapeDtypeStruct((N, c_out, H * s, W * s), x.dtype),
            grid_spec=pltpu.PrefetchScalarGridSpec(
                num_scalar_prefetch=0,
                grid=(N, H // h_t, W // w_tile),
                in_specs=[
                    # Scatter matrices: constant block -> fetched once, stays
                    # VMEM-resident across all grid steps.
                    pl.BlockSpec((s, w_tile, w_tile * s),
                                 lambda n, hb, wb: (0, 0, 0)),
                    pl.BlockSpec((1, C, h_t, w_tile),
                                 lambda n, hb, wb: (n, 0, hb, wb)),
                ],
                out_specs=pl.BlockSpec((1, c_out, h_t * s, w_tile * s),
                                       lambda n, hb, wb: (n, 0, hb, wb)),
            ),
            compiler_params=pltpu.CompilerParams(
                dimension_semantics=("parallel", "parallel", "parallel"),
                vmem_limit_bytes=32 * 1024 * 1024,
            ),
        )

    try:
        return build(_defocus_kernel_strided, h_tile)(e, x)
    except Exception:
        # TODO(synk): remove once sublane-strided stores are guaranteed by the
        # local Mosaic build; this path exists purely as a compile-safety net.
        q = _sublane_quantum(itemsize)
        h_fb = q if H % q == 0 else H   # tiny tile keeps the P_i/iota scratch small
        return build(_defocus_kernel_rowscatter, h_fb)(e, x)


# --------------------------------------------------------------------------- #
# Demo / self-test
# --------------------------------------------------------------------------- #
if __name__ == "__main__":
    N, C, H, W = 2, 4, 16, 16
    gain = 2

    key = jax.random.PRNGKey(0)
    x = jax.random.normal(key, (N, C, H, W), dtype=jnp.float32)

    out = defocus_forward(x, gain=gain)
    out = jax.block_until_ready(out)

    # Pure-JAX reference of the PyTorch view / permute / view.
    def ref(xx):
        n, c, h, w = xx.shape
        co = c // (gain * gain)
        xr = xx.reshape(n, gain, gain, co, h, w)
        xr = jnp.transpose(xr, (0, 3, 4, 1, 5, 2))
        return xr.reshape(n, co, h * gain, w * gain)

    expected = ref(x)
    assert out.shape == expected.shape, (out.shape, expected.shape)
    assert jnp.allclose(out, expected, atol=1e-6, rtol=1e-6), \
        float(jnp.max(jnp.abs(out - expected)))

    print("KERNEL_OK")
</pallas_src>

<mosaic_0001>
module attributes {stable_mosaic.version = 11 : i64} {
  func.func @_defocus_kernel_strided(%arg0: i32, %arg1: i32, %arg2: i32, %arg3: memref<2x16x32xf32, #tpu.memory_space<vmem>>, %arg4: memref<1x4x16x16xf32, #tpu.memory_space<vmem>>, %arg5: memref<1x1x32x32xf32, #tpu.memory_space<vmem>>) attributes {dimension_semantics = [#tpu.dimension_semantics<parallel>, #tpu.dimension_semantics<parallel>, #tpu.dimension_semantics<parallel>], iteration_bounds = array<i64: 2, 1, 1>, scalar_prefetch = 0 : i64, scratch_operands = 0 : i64, tpu.core_type = #tpu.core_type<tc>, window_params = [{pipeline_mode = #tpu.pipeline_mode<synchronous>, transform_indices = @transform_0, window_bounds = array<i64: 2, 16, 32>}, {transform_indices = @transform_1, window_bounds = array<i64: 1, 4, 16, 16>}, {transform_indices = @transform_2, window_bounds = array<i64: 1, 1, 32, 32>}]} {
    %c0 = arith.constant 0 : index
    %c0_0 = arith.constant 0 : index
    %c0_1 = arith.constant 0 : index
    %c0_2 = arith.constant 0 : index
    %0 = vector.load %arg4[%c0, %c0_0, %c0_1, %c0_2] : memref<1x4x16x16xf32, #tpu.memory_space<vmem>>, vector<1x1x16x16xf32>
    %1 = vector.shape_cast %0 : vector<1x1x16x16xf32> to vector<1x16x16xf32>
    %2 = vector.shape_cast %1 : vector<1x16x16xf32> to vector<16x16xf32>
    %c0_3 = arith.constant 0 : index
    %c0_4 = arith.constant 0 : index
    %c0_5 = arith.constant 0 : index
    %3 = vector.load %arg3[%c0_3, %c0_4, %c0_5] : memref<2x16x32xf32, #tpu.memory_space<vmem>>, vector<1x16x32xf32>
    %4 = vector.shape_cast %3 : vector<1x16x32xf32> to vector<16x32xf32>
    %cst = arith.constant dense<0.000000e+00> : vector<16x32xf32>
    %5 = tpu.matmul %2, %4, %cst {dimension_numbers = #tpu.dot_dimension_numbers<[1], [0], [0], [1], [0, 0, 1, 1], [], []>, precision = #tpu.contract_precision<fp32>} : vector<16x16xf32>, vector<16x32xf32>, vector<16x32xf32> -> vector<16x32xf32>
    %c0_6 = arith.constant 0 : index
    %c1 = arith.constant 1 : index
    %c0_7 = arith.constant 0 : index
    %c0_8 = arith.constant 0 : index
    %6 = vector.load %arg4[%c0_6, %c1, %c0_7, %c0_8] : memref<1x4x16x16xf32, #tpu.memory_space<vmem>>, vector<1x1x16x16xf32>
    %7 = vector.shape_cast %6 : vector<1x1x16x16xf32> to vector<1x16x16xf32>
    %8 = vector.shape_cast %7 : vector<1x16x16xf32> to vector<16x16xf32>
    %c1_9 = arith.constant 1 : index
    %c0_10 = arith.constant 0 : index
    %c0_11 = arith.constant 0 : index
    %9 = vector.load %arg3[%c1_9, %c0_10, %c0_11] : memref<2x16x32xf32, #tpu.memory_space<vmem>>, vector<1x16x32xf32>
    %10 = vector.shape_cast %9 : vector<1x16x32xf32> to vector<16x32xf32>
    %cst_12 = arith.constant dense<0.000000e+00> : vector<16x32xf32>
    %11 = tpu.matmul %8, %10, %cst_12 {dimension_numbers = #tpu.dot_dimension_numbers<[1], [0], [0], [1], [0, 0, 1, 1], [], []>, precision = #tpu.contract_precision<fp32>} : vector<16x16xf32>, vector<16x32xf32>, vector<16x32xf32> -> vector<16x32xf32>
    %12 = arith.addf %5, %11 : vector<16x32xf32>
    %13 = vector.shape_cast %12 : vector<16x32xf32> to vector<1x16x32xf32>
    %c0_13 = arith.constant 0 : index
    %c0_14 = arith.constant 0 : index
    %c0_15 = arith.constant 0 : index
    %c0_16 = arith.constant 0 : index
    %14 = tpu.strided_load %arg5[%c0_13, %c0_14, %c0_15, %c0_16] {strides = array<i32: 1, 1, 2, 1>} : memref<1x1x32x32xf32, #tpu.memory_space<vmem>>, vector<1x1x16x32xf32>
    %15 = vector.shape_cast %14 : vector<1x1x16x32xf32> to vector<1x16x32xf32>
    %16 = vector.shape_cast %13 : vector<1x16x32xf32> to vector<1x1x16x32xf32>
    tpu.strided_store %arg5[%c0_13, %c0_14, %c0_15, %c0_16], %16 {strides = array<i32: 1, 1, 2, 1>} : memref<1x1x32x32xf32, #tpu.memory_space<vmem>>, vector<1x1x16x32xf32>
    %c0_17 = arith.constant 0 : index
    %c2 = arith.constant 2 : index
    %c0_18 = arith.constant 0 : index
    %c0_19 = arith.constant 0 : index
    %17 = vector.load %arg4[%c0_17, %c2, %c0_18, %c0_19] : memref<1x4x16x16xf32, #tpu.memory_space<vmem>>, vector<1x1x16x16xf32>
    %18 = vector.shape_cast %17 : vector<1x1x16x16xf32> to vector<1x16x16xf32>
    %19 = vector.shape_cast %18 : vector<1x16x16xf32> to vector<16x16xf32>
    %c0_20 = arith.constant 0 : index
    %c0_21 = arith.constant 0 : index
    %c0_22 = arith.constant 0 : index
    %20 = vector.load %arg3[%c0_20, %c0_21, %c0_22] : memref<2x16x32xf32, #tpu.memory_space<vmem>>, vector<1x16x32xf32>
    %21 = vector.shape_cast %20 : vector<1x16x32xf32> to vector<16x32xf32>
    %cst_23 = arith.constant dense<0.000000e+00> : vector<16x32xf32>
    %22 = tpu.matmul %19, %21, %cst_23 {dimension_numbers = #tpu.dot_dimension_numbers<[1], [0], [0], [1], [0, 0, 1, 1], [], []>, precision = #tpu.contract_precision<fp32>} : vector<16x16xf32>, vector<16x32xf32>, vector<16x32xf32> -> vector<16x32xf32>
    %c0_24 = arith.constant 0 : index
    %c3 = arith.constant 3 : index
    %c0_25 = arith.constant 0 : index
    %c0_26 = arith.constant 0 : index
    %23 = vector.load %arg4[%c0_24, %c3, %c0_25, %c0_26] : memref<1x4x16x16xf32, #tpu.memory_space<vmem>>, vector<1x1x16x16xf32>
    %24 = vector.shape_cast %23 : vector<1x1x16x16xf32> to vector<1x16x16xf32>
    %25 = vector.shape_cast %24 : vector<1x16x16xf32> to vector<16x16xf32>
    %c1_27 = arith.constant 1 : index
    %c0_28 = arith.constant 0 : index
    %c0_29 = arith.constant 0 : index
    %26 = vector.load %arg3[%c1_27, %c0_28, %c0_29] : memref<2x16x32xf32, #tpu.memory_space<vmem>>, vector<1x16x32xf32>
    %27 = vector.shape_cast %26 : vector<1x16x32xf32> to vector<16x32xf32>
    %cst_30 = arith.constant dense<0.000000e+00> : vector<16x32xf32>
    %28 = tpu.matmul %25, %27, %cst_30 {dimension_numbers = #tpu.dot_dimension_numbers<[1], [0], [0], [1], [0, 0, 1, 1], [], []>, precision = #tpu.contract_precision<fp32>} : vector<16x16xf32>, vector<16x32xf32>, vector<16x32xf32> -> vector<16x32xf32>
    %29 = arith.addf %22, %28 : vector<16x32xf32>
    %30 = vector.shape_cast %29 : vector<16x32xf32> to vector<1x16x32xf32>
    %c0_31 = arith.constant 0 : index
    %c0_32 = arith.constant 0 : index
    %c1_33 = arith.constant 1 : index
    %c0_34 = arith.constant 0 : index
    %31 = tpu.strided_load %arg5[%c0_31, %c0_32, %c1_33, %c0_34] {strides = array<i32: 1, 1, 2, 1>} : memref<1x1x32x32xf32, #tpu.memory_space<vmem>>, vector<1x1x16x32xf32>
    %32 = vector.shape_cast %31 : vector<1x1x16x32xf32> to vector<1x16x32xf32>
    %33 = vector.shape_cast %30 : vector<1x16x32xf32> to vector<1x1x16x32xf32>
    tpu.strided_store %arg5[%c0_31, %c0_32, %c1_33, %c0_34], %33 {strides = array<i32: 1, 1, 2, 1>} : memref<1x1x32x32xf32, #tpu.memory_space<vmem>>, vector<1x1x16x32xf32>
    return
  }
  func.func @transform_0(%arg0: i32, %arg1: i32, %arg2: i32) -> (i32, i32, i32) {
    %c0_i32 = arith.constant 0 : i32
    %c0_i32_0 = arith.constant 0 : i32
    %c0_i32_1 = arith.constant 0 : i32
    %c0_i32_2 = arith.constant 0 : i32
    return %c0_i32, %c0_i32_0, %c0_i32_1 : i32, i32, i32
  }
  func.func @transform_1(%arg0: i32, %arg1: i32, %arg2: i32) -> (i32, i32, i32, i32) {
    %c0_i32 = arith.constant 0 : i32
    %c0_i32_0 = arith.constant 0 : i32
    return %arg0, %c0_i32, %arg1, %arg2 : i32, i32, i32, i32
  }
  func.func @transform_2(%arg0: i32, %arg1: i32, %arg2: i32) -> (i32, i32, i32, i32) {
    %c0_i32 = arith.constant 0 : i32
    %c0_i32_0 = arith.constant 0 : i32
    return %arg0, %c0_i32, %arg1, %arg2 : i32, i32, i32, i32
  }
}

module attributes {stable_mosaic.version = 11 : i64} {
  func.func @_defocus_kernel_rowscatter(%arg0: i32, %arg1: i32, %arg2: i32, %arg3: memref<2x16x32xf32, #tpu.memory_space<vmem>>, %arg4: memref<1x4x8x16xf32, #tpu.memory_space<vmem>>, %arg5: memref<1x1x16x32xf32, #tpu.memory_space<vmem>>) attributes {dimension_semantics = [#tpu.dimension_semantics<parallel>, #tpu.dimension_semantics<parallel>, #tpu.dimension_semantics<parallel>], iteration_bounds = array<i64: 2, 2, 1>, scalar_prefetch = 0 : i64, scratch_operands = 0 : i64, tpu.core_type = #tpu.core_type<tc>, window_params = [{pipeline_mode = #tpu.pipeline_mode<synchronous>, transform_indices = @transform_0, window_bounds = array<i64: 2, 16, 32>}, {transform_indices = @transform_1, window_bounds = array<i64: 1, 4, 8, 16>}, {transform_indices = @transform_2, window_bounds = array<i64: 1, 1, 16, 32>}]} {
    %0 = tpu.iota {dimensions = array<i32: 0>} : vector<16x8xi32>
    %1 = tpu.iota {dimensions = array<i32: 1>} : vector<16x8xi32>
    %cst = arith.constant 0.000000e+00 : f32
    %2 = vector.broadcast %cst : f32 to vector<16x32xf32>
    %c0 = arith.constant 0 : index
    %c0_0 = arith.constant 0 : index
    %c0_1 = arith.constant 0 : index
    %c0_2 = arith.constant 0 : index
    %3 = vector.load %arg4[%c0, %c0_0, %c0_1, %c0_2] : memref<1x4x8x16xf32, #tpu.memory_space<vmem>>, vector<1x1x8x16xf32>
    %4 = vector.shape_cast %3 : vector<1x1x8x16xf32> to vector<1x8x16xf32>
    %5 = vector.shape_cast %4 : vector<1x8x16xf32> to vector<8x16xf32>
    %c0_3 = arith.constant 0 : index
    %c0_4 = arith.constant 0 : index
    %c0_5 = arith.constant 0 : index
    %6 = vector.load %arg3[%c0_3, %c0_4, %c0_5] : memref<2x16x32xf32, #tpu.memory_space<vmem>>, vector<1x16x32xf32>
    %7 = vector.shape_cast %6 : vector<1x16x32xf32> to vector<16x32xf32>
    %cst_6 = arith.constant dense<0.000000e+00> : vector<8x32xf32>
    %8 = tpu.matmul %5, %7, %cst_6 {dimension_numbers = #tpu.dot_dimension_numbers<[1], [0], [0], [1], [0, 0, 1, 1], [], []>, precision = #tpu.contract_precision<fp32>} : vector<8x16xf32>, vector<16x32xf32>, vector<8x32xf32> -> vector<8x32xf32>
    %c0_7 = arith.constant 0 : index
    %c1 = arith.constant 1 : index
    %c0_8 = arith.constant 0 : index
    %c0_9 = arith.constant 0 : index
    %9 = vector.load %arg4[%c0_7, %c1, %c0_8, %c0_9] : memref<1x4x8x16xf32, #tpu.memory_space<vmem>>, vector<1x1x8x16xf32>
    %10 = vector.shape_cast %9 : vector<1x1x8x16xf32> to vector<1x8x16xf32>
    %11 = vector.shape_cast %10 : vector<1x8x16xf32> to vector<8x16xf32>
    %c1_10 = arith.constant 1 : index
    %c0_11 = arith.constant 0 : index
    %c0_12 = arith.constant 0 : index
    %12 = vector.load %arg3[%c1_10, %c0_11, %c0_12] : memref<2x16x32xf32, #tpu.memory_space<vmem>>, vector<1x16x32xf32>
    %13 = vector.shape_cast %12 : vector<1x16x32xf32> to vector<16x32xf32>
    %cst_13 = arith.constant dense<0.000000e+00> : vector<8x32xf32>
    %14 = tpu.matmul %11, %13, %cst_13 {dimension_numbers = #tpu.dot_dimension_numbers<[1], [0], [0], [1], [0, 0, 1, 1], [], []>, precision = #tpu.contract_precision<fp32>} : vector<8x16xf32>, vector<16x32xf32>, vector<8x32xf32> -> vector<8x32xf32>
    %15 = arith.addf %8, %14 : vector<8x32xf32>
    %c2_i32 = arith.constant 2 : i32
    %16 = vector.broadcast %c2_i32 : i32 to vector<16x8xi32>
    %17 = arith.muli %16, %1 : vector<16x8xi32>
    %c0_i32 = arith.constant 0 : i32
    %18 = vector.broadcast %c0_i32 : i32 to vector<16x8xi32>
    %19 = arith.addi %17, %18 : vector<16x8xi32>
    %20 = arith.cmpi eq, %0, %19 : vector<16x8xi32>
    %21 = arith.extui %20 : vector<16x8xi1> to vector<16x8xi32>
    %22 = arith.sitofp %21 : vector<16x8xi32> to vector<16x8xf32>
    %cst_14 = arith.constant dense<0.000000e+00> : vector<16x32xf32>
    %23 = tpu.matmul %22, %15, %cst_14 {dimension_numbers = #tpu.dot_dimension_numbers<[1], [0], [0], [1], [0, 0, 1, 1], [], []>, precision = #tpu.contract_precision<fp32>} : vector<16x8xf32>, vector<8x32xf32>, vector<16x32xf32> -> vector<16x32xf32>
    %24 = arith.addf %2, %23 : vector<16x32xf32>
    %c0_15 = arith.constant 0 : index
    %c2 = arith.constant 2 : index
    %c0_16 = arith.constant 0 : index
    %c0_17 = arith.constant 0 : index
    %25 = vector.load %arg4[%c0_15, %c2, %c0_16, %c0_17] : memref<1x4x8x16xf32, #tpu.memory_space<vmem>>, vector<1x1x8x16xf32>
    %26 = vector.shape_cast %25 : vector<1x1x8x16xf32> to vector<1x8x16xf32>
    %27 = vector.shape_cast %26 : vector<1x8x16xf32> to vector<8x16xf32>
    %c0_18 = arith.constant 0 : index
    %c0_19 = arith.constant 0 : index
    %c0_20 = arith.constant 0 : index
    %28 = vector.load %arg3[%c0_18, %c0_19, %c0_20] : memref<2x16x32xf32, #tpu.memory_space<vmem>>, vector<1x16x32xf32>
    %29 = vector.shape_cast %28 : vector<1x16x32xf32> to vector<16x32xf32>
    %cst_21 = arith.constant dense<0.000000e+00> : vector<8x32xf32>
    %30 = tpu.matmul %27, %29, %cst_21 {dimension_numbers = #tpu.dot_dimension_numbers<[1], [0], [0], [1], [0, 0, 1, 1], [], []>, precision = #tpu.contract_precision<fp32>} : vector<8x16xf32>, vector<16x32xf32>, vector<8x32xf32> -> vector<8x32xf32>
    %c0_22 = arith.constant 0 : index
    %c3 = arith.constant 3 : index
    %c0_23 = arith.constant 0 : index
    %c0_24 = arith.constant 0 : index
    %31 = vector.load %arg4[%c0_22, %c3, %c0_23, %c0_24] : memref<1x4x8x16xf32, #tpu.memory_space<vmem>>, vector<1x1x8x16xf32>
    %32 = vector.shape_cast %31 : vector<1x1x8x16xf32> to vector<1x8x16xf32>
    %33 = vector.shape_cast %32 : vector<1x8x16xf32> to vector<8x16xf32>
    %c1_25 = arith.constant 1 : index
    %c0_26 = arith.constant 0 : index
    %c0_27 = arith.constant 0 : index
    %34 = vector.load %arg3[%c1_25, %c0_26, %c0_27] : memref<2x16x32xf32, #tpu.memory_space<vmem>>, vector<1x16x32xf32>
    %35 = vector.shape_cast %34 : vector<1x16x32xf32> to vector<16x32xf32>
    %cst_28 = arith.constant dense<0.000000e+00> : vector<8x32xf32>
    %36 = tpu.matmul %33, %35, %cst_28 {dimension_numbers = #tpu.dot_dimension_numbers<[1], [0], [0], [1], [0, 0, 1, 1], [], []>, precision = #tpu.contract_precision<fp32>} : vector<8x16xf32>, vector<16x32xf32>, vector<8x32xf32> -> vector<8x32xf32>
    %37 = arith.addf %30, %36 : vector<8x32xf32>
    %c2_i32_29 = arith.constant 2 : i32
    %38 = vector.broadcast %c2_i32_29 : i32 to vector<16x8xi32>
    %39 = arith.muli %38, %1 : vector<16x8xi32>
    %c1_i32 = arith.constant 1 : i32
    %40 = vector.broadcast %c1_i32 : i32 to vector<16x8xi32>
    %41 = arith.addi %39, %40 : vector<16x8xi32>
    %42 = arith.cmpi eq, %0, %41 : vector<16x8xi32>
    %43 = arith.extui %42 : vector<16x8xi1> to vector<16x8xi32>
    %44 = arith.sitofp %43 : vector<16x8xi32> to vector<16x8xf32>
    %cst_30 = arith.constant dense<0.000000e+00> : vector<16x32xf32>
    %45 = tpu.matmul %44, %37, %cst_30 {dimension_numbers = #tpu.dot_dimension_numbers<[1], [0], [0], [1], [0, 0, 1, 1], [], []>, precision = #tpu.contract_precision<fp32>} : vector<16x8xf32>, vector<8x32xf32>, vector<16x32xf32> -> vector<16x32xf32>
    %46 = arith.addf %24, %45 : vector<16x32xf32>
    %47 = vector.shape_cast %46 : vector<16x32xf32> to vector<1x16x32xf32>
    %c0_31 = arith.constant 0 : index
    %c0_32 = arith.constant 0 : index
    %c0_33 = arith.constant 0 : index
    %c0_34 = arith.constant 0 : index
    %48 = vector.load %arg5[%c0_31, %c0_32, %c0_33, %c0_34] : memref<1x1x16x32xf32, #tpu.memory_space<vmem>>, vector<1x1x16x32xf32>
    %49 = vector.shape_cast %48 : vector<1x1x16x32xf32> to vector<1x16x32xf32>
    %50 = vector.shape_cast %47 : vector<1x16x32xf32> to vector<1x1x16x32xf32>
    tpu.vector_store %arg5[%c0_31, %c0_32, %c0_33, %c0_34], %50 {strides = array<i32>} : memref<1x1x16x32xf32, #tpu.memory_space<vmem>>, vector<1x1x16x32xf32>,
    return
  }
  func.func @transform_0(%arg0: i32, %arg1: i32, %arg2: i32) -> (i32, i32, i32) {
    %c0_i32 = arith.constant 0 : i32
    %c0_i32_0 = arith.constant 0 : i32
    %c0_i32_1 = arith.constant 0 : i32
    %c0_i32_2 = arith.constant 0 : i32
    return %c0_i32, %c0_i32_0, %c0_i32_1 : i32, i32, i32
  }
  func.func @transform_1(%arg0: i32, %arg1: i32, %arg2: i32) -> (i32, i32, i32, i32) {
    %c0_i32 = arith.constant 0 : i32
    %c0_i32_0 = arith.constant 0 : i32
    return %arg0, %c0_i32, %arg1, %arg2 : i32, i32, i32, i32
  }
  func.func @transform_2(%arg0: i32, %arg1: i32, %arg2: i32) -> (i32, i32, i32, i32) {
    %c0_i32 = arith.constant 0 : i32
    %c0_i32_0 = arith.constant 0 : i32
    return %arg0, %c0_i32, %arg1, %arg2 : i32, i32, i32, i32
  }
}

</mosaic_0001>

<bundles_post_ra>
// kernel: tpu_custom_call.1
= control target key start
LH: loop header
LB: loop body
LE: loop exit
PB: predicated region body
PF: predicated region fallthrough
CT: control target
= control target key end

     0   :  { %7 = vsyncpa [#allocation3], 0  ;;  %s1705_s0 = inlined_call_operand.hbm [shape: f32[2,16,32], index: 0, kind: input, shape index: {}]   ;;  %s1706_s1 = inlined_call_operand.hbm [shape: f32[2,4,16,16], index: 1, kind: input, shape index: {}]   ;;  %s1707_s2 = inlined_call_operand.hbm [shape: f32[2,1,32,32], index: 2, kind: output, shape index: {}]  }
   0x1   :  { %8 = vsyncpa [#allocation6], 0 }
   0x2   :  { %10 = vsyncpa [#allocation6 + $0x1], 0 }
   0x3   :  { %11 = vsyncpa [#allocation4], 0 }
   0x4   :  { %13 = vsyncpa [#allocation4 + $0x1], 0  ;;  %s1421_s9 = smov 0   ;;  %s1423_s10 = smov 0  }
   0x5   :  { %s1425_s11 = smov 0   ;;  %s1427_s12 = smov 0  }
   0x6   :  { %s1429_s13 = smov 0   ;;  %s1431_s14 = smov 0  }
   0x7 LB: > { %s1148_s15 = sadd.s32 4294967295, %s1399_s14   ;;  %s1149_s16 = sadd.s32 4294967294, %s1399_s14   ;;  %s1399_s14 = sphi %s1431_s14, %s19_s14   ;;  %s1395_s13 = sphi %s1429_s13, %s1719_s13   ;;  %s1391_s12 = sphi %s1427_s12, %s1718_s12   ;;  %s1387_s11 = sphi %s1425_s11, %s1717_s11   ;;  %s1383_s10 = sphi %s1423_s10, %s1716_s10   ;;  %s1379_s9 = sphi %s1421_s9, %s1715_s9  }
   0x8   : > { %p83_p0 = scmp.ne.s32.totalorder %s1383_s10, %s1379_s9  ;;  %p1455_p1 = scmp.eq.s32.totalorder %s1148_s15, 0 }
   0x9   : > { %p1459_p2 = scmp.eq.s32.totalorder %s1148_s15, 1  ;;  %p117_p3 = scmp.eq.s32.totalorder %s1149_s16, 1 }
   0xa   : > { %p1465_p4 = por %p1455_p1, %p83_p0  ;;  %p1150_p5 = scmp.ge.s32.totalorder %s1399_s14, 1 }
   0xb   : > { %p1470_p6 = por %p117_p3, %p83_p0  ;;  %p124_p7 = scmp.lt.s32.totalorder %s1399_s14, 3 }
   0xc   : > { %s135_s23 = sshll.u32 %s1705_s0, 4  ;;  %s1401_s25 = smov [#allocation2]   ;;  %s136_s23 = int_to_ptr.hbm [resolvable:$true] %s135_s23 }
   0xd   : > { %p1478_p8 = pnand %p1150_p5, %p124_p7  ;;  %s137_s26 = sshll.u32 %s1401_s25, 4  ;;  %s138_s26 = int_to_ptr.vmem [resolvable:$true] %s137_s26 }
   0xe   : > { %p1152_p11 = scmp.ge.s32.totalorder %s1399_s14, 2  ;;  %s1402_s27 = smov 128  }
   0xf   : > { %p1184_p9 = pneg %p1478_p8  ;;  %s1403_s28 = smov 8  }
  0x10   : > { %s38_s29 = sadd.s32 1, %s1395_s13  ;;  %s70_s30 = sadd.s32 1, %s1387_s11 }
  0x11   : > { %p1185_p10 = pnand %p1184_p9, %p1455_p1  ;;  %p40_p12 = scmp.ge.s32.totalorder %s38_s29, 2 }
  0x12   : > { %p77_p13 = scmp.ne.s32.totalorder %s1387_s11, %s1383_s10  ;;  %p78_p0 = scmp.eq.s32.totalorder %s1399_s14, 0 }
  0x13   : > { %1187 = dma.hbm_to_vmem [thread:$0]  (!%p1185_p10), %s136_s23, 512, %s138_s26, [#allocation3], %s1402_s27, %s1402_s27, %s1403_s28  }
  0x14   : > { %s1721_s29 = smov (%p40_p12, %s38_s29), 0  ;;  %p1497_p3 = por %p78_p0, %p77_p13 }
  0x15   : > { %p1503_p5 = por %p1459_p2, %p77_p13  ;;  %s63_s5 = ssub.s32 %s1395_s13, %s1721_s29 }
  0x16   : > { %p1197_p7 = scmp.lt.s32.totalorder %s1399_s14, 2  ;;  %p68_p9 = scmp.eq.s32.totalorder %s63_s5, 0 }
  0x17   : > { %s151_s6 = sand.u32 1, %s1387_s11   ;;  %s1174_s15 = sshll.u32 %s1395_s13, 6 }
  0x18   : > { %s1153_s7 = sshll.u32 %s151_s6, 6  ;;  %s163_s22 = scalar_lea.hbm %s1706_s1, %s1174_s15 }
  0x19   : > { %s1512_s8 = scalar_select %p68_p9, %s1387_s11, %s70_s30  }
  0x1a   : > { %s155_s23 = scalar_lea.vmem [#allocation5], %s1153_s7  ;;  %s164_s18 = sshll.u32 %s163_s22, 4  ;;  %s165_s18 = int_to_ptr.hbm [resolvable:$true] %s164_s18 }
  0x1b   : > { %s166_s25 = sshll.u32 %s155_s23, 4  ;;  %p1189_p2 = pnand %p1197_p7, %p1497_p3  ;;  %s167_s25 = int_to_ptr.vmem [resolvable:$true] %s166_s25 }
  0x1c   : > { %s152_s26 = scalar_lea.sflag [#allocation6], %s151_s6  ;;  %178 = sbr.rel (%p1478_p8) target bundleno = 277 (0x115), region = 28 }
  0x1d   : > { %1191 = dma.hbm_to_vmem [thread:$0]  (!%p1189_p2), %s165_s18, 1024, %s167_s25, %s152_s26, %s1402_s27, %s1402_s27, %s1403_s28  }
  0x21   : > { %1366 = dma.done.wait (%p1455_p1), [#allocation3], 512  }
  0x22   : > { %1368 = vsyncadd (%p1455_p1), [#allocation3], 4294966784  ;;  %s1530_s30 = sand.u32 1, %s1383_s10  }
  0x23   : > { %s1158_s3 = sshll.u32 %s1530_s30, 6  ;;  %s186_s5 = scalar_lea.sflag [#allocation6], %s1530_s30 }
  0x24   : > { %s1534_s6 = scalar_lea.vmem [#allocation5], %s1158_s3 }
  0x25   : > { %1370 = dma.done.wait (%p1465_p4), %s186_s5, 1024  }
  0x26   : > { %1372 = vsyncadd (%p1465_p4), %s186_s5, 4294966272  ;;  %vm223_vm0 = vcmask 130048   ;;  %v222_v0 = vld [vmem:[#allocation2 + $0x18] sm:$0xff]  ;;  %v221_v1 = vld [vmem:[#allocation2 + $0x10] sm:$0xff]  ;;  %s1159_s17 = sshll.u32 %s1530_s30, 5  ;;  %s1175_s24 = sshll.u32 %s1391_s12, 5 }
  0x27   : > { %v1160_v2 = vld [vmem:[%s1534_s6 + $0x10] sm:$0xff]  ;;  %v1541_v3 = vand.u32 4294901760, %v222_v0  ;;  %v1543_v4 = vand.u32 4294901760, %v221_v1  ;;  %v216_v6 = vld [vmem:[#allocation2 + $0x8] sm:$0xff]  ;;  %v1161_v7 = vld [vmem:[%s1534_s6 + $0x18] sm:$0xff]  ;;  %s1660_s19 = scalar_lea.vmem [#allocation7], %s1159_s17  ;;  %s1040_s7 = scalar_lea.hbm %s1707_s2, %s1175_s24 }
  0x28   : > { %v225_v5 = vsel %vm223_vm0, %v1160_v2, 0  ;;  %v215_v8 = vld [vmem:[#allocation2] sm:$0xff]  ;;  %v1549_v10 = vand.u32 4294901760, %v216_v6  ;;  %v228_v11 = vsel %vm223_vm0, %v1161_v7, 0  ;;  %v214_v28 = vld [vmem:[%s1534_s6 + $0x8] sm:$0xff]  ;;  %v1165_v52 = vld [vmem:[%s1534_s6 + $0x30] sm:$0xff] }
  0x29   : > { %v1547_v9 = vand.u32 4294901760, %v225_v5  ;;  %v1552_v12 = vand.u32 4294901760, %v215_v8  ;;  %v213_v13 = vld [vmem:[%s1534_s6] sm:$0xff]  ;;  %v1556_v14 = vsub.f32 %v222_v0, %v1541_v3  ;;  %245 = vmatpush.msra.mxu0 %v1541_v3  ;;  %v1560_v15 = vsub.f32 %v221_v1, %v1543_v4  ;;  %346 = vmatpush.msra.mxu3 %v1541_v3  ;;  %v1166_v55 = vld [vmem:[%s1534_s6 + $0x38] sm:$0xff]  ;;  %v1164_v1 = vld [vmem:[%s1534_s6 + $0x28] sm:$0xff]  ;;  %s1041_s15 = sshll.u32 %s1660_s19, 4  ;;  %s1042_s15 = int_to_ptr.vmem [resolvable:$true] %s1041_s15 }
  0x2a   : > { %v1563_v16 = vand.u32 4294901760, %v228_v11  ;;  %v421_v17 = vsel %vm223_vm0, %v213_v13, 0  ;;  %v1568_v19 = vsub.f32 %v216_v6, %v1549_v10  ;;  %v424_v38 = vsel %vm223_vm0, %v214_v28, 0  ;;  %v1163_v58 = vld [vmem:[%s1534_s6 + $0x20] sm:$0xff]  ;;  %s1043_s16 = sshll.u32 %s1040_s7, 4  ;;  %s1026_s12 = scalar_lea.sflag [#allocation4], %s1530_s30  ;;  %s1044_s16 = int_to_ptr.hbm [resolvable:$true] %s1043_s16 }
  0x2b   : > { %v249_v18 = vsub.f32 %v225_v5, %v1547_v9  ;;  %v1571_v20 = vsub.f32 %v215_v8, %v1552_v12  ;;  %v1573_v21 = vand.u32 4294901760, %v421_v17  ;;  %316 = vmatpush.msra.mxu2 %v1556_v14  ;;  %247 = vmatpush.msra.mxu0 %v1543_v4  ;;  %v1578_v22 = vand.u32 4294901760, %v1556_v14  ;;  %s1327_s21 = sshra.s32 %s1044_s16, 4  ;;  %s1333_s18 = scalar_lea.hbm %s1707_s2, 64  ;;  %s1328_s21 = int_to_ptr.hbm [resolvable:$true] %s1327_s21 }
  0x2c   : > { %v1581_v23 = vand.u32 4294901760, %v1560_v15  ;;  %v257_v24 = vsub.f32 %v228_v11, %v1563_v16  ;;  %348 = vmatpush.msra.mxu3 %v1543_v4  ;;  %v1586_v26 = vand.u32 4294901760, %v1568_v19  ;;  %v452_v44 = vand.u32 4294901760, %v424_v38  ;;  %s1329_s22 = scalar_lea.hbm %s1328_s21, 32  ;;  %p1334_p10 = scmp.lt.s32.totalorder %s1328_s21, %s1707_s2 }
  0x2d   : > { %v250_v25 = vand.u32 4294901760, %v249_v18  ;;  %v1589_v27 = vand.u32 4294901760, %v1571_v20  ;;  %319 = vmatpush.msra.mxu2 %v1560_v15  ;;  %v282_v29 = vsub.f32 %v1556_v14, %v1578_v22  ;;  %379 = vmatpush.msrb.mxu0 %v1578_v22  ;;  %v1599_v31 = vsub.f32 %v421_v17, %v1573_v21  ;;  %p1330_p1 = scmp.ne.s32.totalorder %s1328_s21, %s1329_s22  ;;  %p1335_p12 = scmp.lt.s32.totalorder %s1333_s18, %s1329_s22 }
  0x2e   : > { %v288_v30 = vsub.f32 %v1560_v15, %v1581_v23  ;;  %322 = vmatmul.f32.vlgmr.msra.gmra.mxu2 %v249_v18  ;;  %v478_v33 = vsub.f32 %v1568_v19, %v1586_v26  ;;  %v258_v34 = vand.u32 4294901760, %v257_v24  ;;  %v453_v47 = vsub.f32 %v424_v38, %v452_v44 }
  0x2f   : > { %v251_v32 = vsub.f32 %v249_v18, %v250_v25  ;;  %352 = vmatmul.f32.vlgmr.msra.gmra.mxu3 %v250_v25  ;;  %v484_v35 = vsub.f32 %v1571_v20, %v1589_v27  ;;  %441 = vmatpush.msrb.mxu2 %v1549_v10  ;;  %v283_v36 = vand.u32 4294901760, %v282_v29  ;;  %v446_v43 = vand.u32 4294901760, %v1599_v31  ;;  %p1331_p4 = pnand %p1330_p1, %p1503_p5  ;;  %p1336_p13 = por %p1335_p12, %p1334_p10 }
  0x30   : > { %v289_v37 = vand.u32 4294901760, %v288_v30  ;;  %383 = vmatpush.msrb.mxu0 %v1581_v23  ;;  %v479_v40 = vand.u32 4294901760, %v478_v33  ;;  %v259_v42 = vsub.f32 %v257_v24, %v258_v34  ;;  %v454_v49 = vand.u32 4294901760, %v453_v47 }
  0x31   : > { %v252_v39 = vand.u32 4294901760, %v251_v32  ;;  %v485_v41 = vand.u32 4294901760, %v484_v35  ;;  %284 = vmatpush.msra.mxu1 %v283_v36  ;;  %443 = vmatpush.msrb.mxu2 %v1552_v12  ;;  %v447_v46 = vsub.f32 %v1599_v31, %v446_v43  ;;  %v630_v53 = vsel %vm223_vm0, %v1165_v52, 0  ;;  %p1332_p8 = pneg %p1331_p4 }
  0x32   : > { %480 = vmatpush.msrb.mxu3 %v479_v40  ;;  %v260_v45 = vand.u32 4294901760, %v259_v42  ;;  %v455_v50 = vsub.f32 %v453_v47, %v454_v49  ;;  %v653_v54 = vand.u32 4294901760, %v630_v53  ;;  %v633_v57 = vsel %vm223_vm0, %v1166_v55, 0 }
  0x33   : > { %253 = vmatmul.f32.vlgmr.msra.gmra.mxu0 %v252_v39  ;;  %290 = vmatpush.msra.mxu1 %v289_v37  ;;  %v448_v48 = vand.u32 4294901760, %v447_v46  ;;  %v661_v60 = vand.u32 4294901760, %v633_v57  ;;  %v826_v61 = vsel %vm223_vm0, %v1163_v58, 0  ;;  %v829_v6 = vsel %vm223_vm0, %v1164_v1, 0  ;;  %p1337_p0 = pnand %p1336_p13, %p1332_p8 }
  0x34   : > { %575 = vmatpush.msra.mxu2 %v1586_v26  ;;  %292 = vmatmul.f32.vlgmr.msra.gmra.mxu1 %v1547_v9  ;;  %v456_v51 = vand.u32 4294901760, %v455_v50  ;;  %v654_v56 = vsub.f32 %v630_v53, %v653_v54  ;;  %v849_v0 = vand.u32 4294901760, %v826_v61  ;;  %v857_v8 = vand.u32 4294901760, %v829_v6 }
  0x35   : > { %486 = vmatpush.msrb.mxu3 %v485_v41  ;;  %408 = vmatpush.msrb.mxu1 %v1541_v3  ;;  %v662_v63 = vsub.f32 %v633_v57, %v661_v60 }
  0x36   : > { %512 = vmatpush.msra.mxu0 %v1568_v19  ;;  %327 = vmatmul.f32.gmra.mxu2 %v257_v24  ;;  %v655_v59 = vand.u32 4294901760, %v654_v56  ;;  %v850_v5 = vsub.f32 %v826_v61, %v849_v0  ;;  %v858_v13 = vsub.f32 %v829_v6, %v857_v8 }
  0x37   : > { %358 = vmatmul.f32.gmra.mxu3 %v258_v34  ;;  %410 = vmatpush.msrb.mxu1 %v1543_v4 }
  0x38   : > { %604 = vmatpush.msra.mxu3 %v1549_v10  ;;  %579 = vmatpush.msra.mxu2 %v1589_v27  ;;  %v656_v62 = vsub.f32 %v654_v56, %v655_v59  ;;  %v851_v7 = vand.u32 4294901760, %v850_v5 }
  0x39   : > { %542 = vmatpush.msra.mxu1 %v1549_v10  ;;  %515 = vmatpush.msra.mxu0 %v1571_v20 }
  0x3a   : > { %606 = vmatpush.msra.mxu3 %v1552_v12  ;;  %v657_v2 = vand.u32 4294901760, %v656_v62  ;;  %v852_v11 = vsub.f32 %v850_v5, %v851_v7 }
  0x3b   : > { %261 = vmatmul.f32.gmra.mxu0 %v260_v45  ;;  %544 = vmatpush.msra.mxu1 %v1552_v12 }
  0x3c   : > { %296 = vmatmul.f32.gmra.mxu1 %v1563_v16 }
  0x3e   : > { %449 = vmatmul.f32.vlgmr.msrb.gmra.mxu2 %v448_v48 }
  0x3f   : > { %488 = vmatmul.f32.vlgmr.msrb.gmra.mxu3 %v1573_v21  ;;  %721 = vmatpush.msrb.mxu2 %v1556_v14  ;;  %v853_v14 = vand.u32 4294901760, %v852_v11 }
  0x40   : > { %751 = vmatpush.msrb.mxu3 %v1541_v3 }
  0x41   : > { %724 = vmatpush.msrb.mxu2 %v1560_v15  ;;  %v859_v15 = vand.u32 4294901760, %v858_v13 }
  0x42   : > { %753 = vmatpush.msrb.mxu3 %v1543_v4 }
  0x43   : > { %385 = vmatmul.f32.vlgmr.msrb.gmra.mxu0 %v1547_v9 }
  0x44   : > { %650 = vmatpush.msrb.mxu0 %v1541_v3  ;;  %412 = vmatmul.f32.vlgmr.msrb.gmra.mxu1 %v1547_v9 }
  0x45   : > { %689 = vmatpush.msrb.mxu1 %v283_v36 }
  0x46   : > { %652 = vmatpush.msrb.mxu0 %v1543_v4  ;;  %457 = vmatmul.f32.gmra.mxu2 %v456_v51 }
  0x47   : > { %492 = vmatmul.f32.gmra.mxu3 %v452_v44  ;;  %695 = vmatpush.msrb.mxu1 %v289_v37 }
  0x4b   : > { %389 = vmatmul.f32.gmra.mxu0 %v1563_v16 }
  0x4c   : > { %416 = vmatmul.f32.gmra.mxu1 %v1563_v16  ;;  %v860_v16 = vsub.f32 %v858_v13, %v859_v15 }
  0x4e   : > { %581 = vmatmul.f32.vlgmr.msra.gmra.mxu2 %v1573_v21  ;;  %v861_v17 = vand.u32 4294901760, %v860_v16 }
  0x4f   : > { %608 = vmatmul.f32.vlgmr.msra.gmra.mxu3 %v1573_v21  ;;  %846 = vmatpush.msra.mxu2 %v1549_v10 }
  0x50   : > { %885 = vmatpush.msra.mxu3 %v479_v40 }
  0x51   : > { %848 = vmatpush.msra.mxu2 %v1552_v12 }
  0x52   : > { %891 = vmatpush.msra.mxu3 %v485_v41 }
  0x53   : > { %518 = vmatmul.f32.vlgmr.msra.gmra.mxu0 %v1599_v31 }
  0x54   : > { %784 = vmatpush.msra.mxu0 %v1578_v22  ;;  %548 = vmatmul.f32.vlgmr.msra.gmra.mxu1 %v446_v43 }
  0x55   : > { %813 = vmatpush.msra.mxu1 %v1541_v3  ;;  %v663_v3 = vand.u32 4294901760, %v662_v63 }
  0x56   : > { %788 = vmatpush.msra.mxu0 %v1581_v23  ;;  %585 = vmatmul.f32.gmra.mxu2 %v452_v44 }
  0x57   : > { %612 = vmatmul.f32.gmra.mxu3 %v452_v44  ;;  %815 = vmatpush.msra.mxu1 %v1543_v4  ;;  %v664_v4 = vsub.f32 %v662_v63, %v663_v3 }
  0x59   : > { %v665_v9 = vand.u32 4294901760, %v664_v4 }
  0x5b   : > { %523 = vmatmul.f32.gmra.mxu0 %v453_v47 }
  0x5c   : > { %554 = vmatmul.f32.gmra.mxu1 %v454_v49 }
  0x5e   : > { %727 = vmatmul.f32.vlgmr.msrb.gmra.mxu2 %v654_v56 }
  0x5f   : > { %757 = vmatmul.f32.vlgmr.msrb.gmra.mxu3 %v655_v59  ;;  %980 = vmatpush.msrb.mxu2 %v1586_v26 }
  0x60   : > { %1009 = vmatpush.msrb.mxu3 %v1549_v10 }
  0x61   : > { %984 = vmatpush.msrb.mxu2 %v1589_v27 }
  0x62   : > { %1011 = vmatpush.msrb.mxu3 %v1552_v12 }
  0x63   : > { %658 = vmatmul.f32.vlgmr.msrb.gmra.mxu0 %v657_v2 }
  0x64   : > { %917 = vmatpush.msrb.mxu0 %v1568_v19  ;;  %697 = vmatmul.f32.vlgmr.msrb.gmra.mxu1 %v653_v54 }
  0x65   : > { %947 = vmatpush.msrb.mxu1 %v1549_v10 }
  0x66   : > { %920 = vmatpush.msrb.mxu0 %v1571_v20  ;;  %732 = vmatmul.f32.gmra.mxu2 %v662_v63 }
  0x67   : > { %763 = vmatmul.f32.gmra.mxu3 %v663_v3  ;;  %949 = vmatpush.msrb.mxu1 %v1552_v12 }
  0x6b   : > { %666 = vmatmul.f32.gmra.mxu0 %v665_v9 }
  0x6c   : > { %701 = vmatmul.f32.gmra.mxu1 %v661_v60 }
  0x6e   : > { %854 = vmatmul.f32.vlgmr.msra.gmra.mxu2 %v853_v14 }
  0x6f   : > { %893 = vmatmul.f32.vlgmr.msra.gmra.mxu3 %v849_v0 }
  0x73   : > { %790 = vmatmul.f32.vlgmr.msra.gmra.mxu0 %v653_v54 }
  0x74   : > { %817 = vmatmul.f32.vlgmr.msra.gmra.mxu1 %v653_v54 }
  0x76   : > { %862 = vmatmul.f32.gmra.mxu2 %v861_v17 }
  0x77   : > { %897 = vmatmul.f32.gmra.mxu3 %v857_v8 }
  0x7b   : > { %794 = vmatmul.f32.gmra.mxu0 %v661_v60 }
  0x7c   : > { %821 = vmatmul.f32.gmra.mxu1 %v661_v60 }
  0x7e   : > { %986 = vmatmul.f32.vlgmr.msrb.gmra.mxu2 %v849_v0 }
  0x7f   : > { %1013 = vmatmul.f32.vlgmr.msrb.gmra.mxu3 %v849_v0 }
  0x83   : > { %923 = vmatmul.f32.vlgmr.msrb.gmra.mxu0 %v850_v5 }
  0x84   : > { %953 = vmatmul.f32.vlgmr.msrb.gmra.mxu1 %v851_v7 }
  0x86   : > { %990 = vmatmul.f32.gmra.mxu2 %v857_v8 }
  0x87   : > { %1017 = vmatmul.f32.gmra.mxu3 %v857_v8 }
  0x8b   : > { %928 = vmatmul.f32.gmra.mxu0 %v858_v13 }
  0x8c   : > { %959 = vmatmul.f32.gmra.mxu1 %v859_v15 }
  0xb0   : > { %v254_v10 = vpop.f32.mrf.mxu0 }
  0xb1   : > { %v293_v12 = vpop.f32.mrf.mxu1  ;;  %v323_v18 = vpop.f32.mrf.mxu2 }
  0xb2   : > { %v353_v19 = vpop.f32.mrf.mxu3  ;;  %v294_v21 = vadd.f32 %v293_v12, %v254_v10 }
  0xb4   : > { %v324_v25 = vadd.f32 %v323_v18, %v294_v21 }
  0xb6   : > { %v354_v27 = vadd.f32 %v353_v19, %v324_v25 }
  0xb8   : > { %v262_v20 = vpop.f32.mrf.mxu0 }
  0xb9   : > { %v297_v22 = vpop.f32.mrf.mxu1  ;;  %v328_v23 = vpop.f32.mrf.mxu2 }
  0xba   : > { %v359_v24 = vpop.f32.mrf.mxu3  ;;  %v298_v28 = vadd.f32 %v297_v22, %v262_v20 }
  0xbc   : > { %v329_v33 = vadd.f32 %v328_v23, %v298_v28 }
  0xbe   : > { %v360_v36 = vadd.f32 %v359_v24, %v329_v33 }
  0xc0   : > { %v386_v26 = vpop.f32.mrf.mxu0 }
  0xc1   : > { %v413_v29 = vpop.f32.mrf.mxu1  ;;  %v450_v30 = vpop.f32.mrf.mxu2  ;;  %v387_v31 = vadd.f32 %v386_v26, %v354_v27 }
  0xc2   : > { %v489_v32 = vpop.f32.mrf.mxu3 }
  0xc3   : > { %v414_v34 = vadd.f32 %v413_v29, %v387_v31 }
  0xc5   : > { %v451_v39 = vadd.f32 %v450_v30, %v414_v34 }
  0xc7   : > { %v490_v42 = vadd.f32 %v489_v32, %v451_v39 }
  0xc8   : > { %v390_v35 = vpop.f32.mrf.mxu0 }
  0xc9   : > { %v417_v37 = vpop.f32.mrf.mxu1  ;;  %v458_v38 = vpop.f32.mrf.mxu2  ;;  %v391_v40 = vadd.f32 %v390_v35, %v360_v36 }
  0xca   : > { %v493_v41 = vpop.f32.mrf.mxu3 }
  0xcb   : > { %v418_v43 = vadd.f32 %v417_v37, %v391_v40 }
  0xcd   : > { %v459_v48 = vadd.f32 %v458_v38, %v418_v43 }
  0xcf   : > { %v494_v52 = vadd.f32 %v493_v41, %v459_v48 }
  0xd0   : > { %v519_v44 = vpop.f32.mrf.mxu0 }
  0xd1   : > { %v520_v45 = vadd.f32 %v519_v44, %v490_v42  ;;  %v549_v46 = vpop.f32.mrf.mxu1  ;;  %v582_v47 = vpop.f32.mrf.mxu2 }
  0xd2   : > { %v609_v50 = vpop.f32.mrf.mxu3 }
  0xd3   : > { %v550_v49 = vadd.f32 %v549_v46, %v520_v45 }
  0xd5   : > { %v583_v51 = vadd.f32 %v582_v47, %v550_v49 }
  0xd7   : > { %v610_v53 = vadd.f32 %v609_v50, %v583_v51 }
  0xd8   : > { %v524_v54 = vpop.f32.mrf.mxu0 }
  0xd9   : > { %616 = vst [vmem:[%s1660_s19] ss:$2 sm:$0xff] %v610_v53  ;;  %v525_v55 = vadd.f32 %v524_v54, %v494_v52  ;;  %v555_v56 = vpop.f32.mrf.mxu1  ;;  %v586_v57 = vpop.f32.mrf.mxu2 }
  0xda   : > { %v613_v59 = vpop.f32.mrf.mxu3 }
  0xdb   : > { %v556_v58 = vadd.f32 %v555_v56, %v525_v55 }
  0xdd   : > { %v587_v60 = vadd.f32 %v586_v57, %v556_v58 }
  0xdf   : > { %v614_v61 = vadd.f32 %v613_v59, %v587_v60 }
  0xe0   : > { %v659_v62 = vpop.f32.mrf.mxu0 }
  0xe1   : > { %1162 = vst [vmem:[%s1660_s19 + $0x10] ss:$2 sm:$0xff] %v614_v61  ;;  %v698_v63 = vpop.f32.mrf.mxu1  ;;  %v728_v0 = vpop.f32.mrf.mxu2 }
  0xe2   : > { %v758_v1 = vpop.f32.mrf.mxu3  ;;  %v699_v3 = vadd.f32 %v698_v63, %v659_v62 }
  0xe4   : > { %v729_v7 = vadd.f32 %v728_v0, %v699_v3 }
  0xe6   : > { %v759_v9 = vadd.f32 %v758_v1, %v729_v7 }
  0xe8   : > { %v667_v2 = vpop.f32.mrf.mxu0 }
  0xe9   : > { %v702_v5 = vpop.f32.mrf.mxu1  ;;  %v733_v6 = vpop.f32.mrf.mxu2 }
  0xea   : > { %v764_v4 = vpop.f32.mrf.mxu3  ;;  %v703_v11 = vadd.f32 %v702_v5, %v667_v2 }
  0xec   : > { %v734_v17 = vadd.f32 %v733_v6, %v703_v11 }
  0xee   : > { %v765_v18 = vadd.f32 %v764_v4, %v734_v17 }
  0xf0   : > { %v791_v8 = vpop.f32.mrf.mxu0 }
  0xf1   : > { %v818_v13 = vpop.f32.mrf.mxu1  ;;  %v855_v14 = vpop.f32.mrf.mxu2  ;;  %v792_v15 = vadd.f32 %v791_v8, %v759_v9 }
  0xf2   : > { %v894_v16 = vpop.f32.mrf.mxu3 }
  0xf3   : > { %v819_v10 = vadd.f32 %v818_v13, %v792_v15 }
  0xf5   : > { %v856_v21 = vadd.f32 %v855_v14, %v819_v10 }
  0xf7   : > { %v895_v24 = vadd.f32 %v894_v16, %v856_v21 }
  0xf8   : > { %v795_v12 = vpop.f32.mrf.mxu0 }
  0xf9   : > { %v822_v19 = vpop.f32.mrf.mxu1  ;;  %v863_v20 = vpop.f32.mrf.mxu2  ;;  %v796_v22 = vadd.f32 %v795_v12, %v765_v18 }
  0xfa   : > { %v898_v23 = vpop.f32.mrf.mxu3 }
  0xfb   : > { %v823_v25 = vadd.f32 %v822_v19, %v796_v22 }
  0xfd   : > { %v864_v30 = vadd.f32 %v863_v20, %v823_v25 }
  0xff   : > { %v899_v34 = vadd.f32 %v898_v23, %v864_v30 }
 0x100   : > { %v924_v26 = vpop.f32.mrf.mxu0 }
 0x101   : > { %v925_v27 = vadd.f32 %v924_v26, %v895_v24  ;;  %v954_v28 = vpop.f32.mrf.mxu1  ;;  %v987_v29 = vpop.f32.mrf.mxu2 }
 0x102   : > { %v1014_v32 = vpop.f32.mrf.mxu3 }
 0x103   : > { %v955_v31 = vadd.f32 %v954_v28, %v925_v27 }
 0x105   : > { %v988_v33 = vadd.f32 %v987_v29, %v955_v31 }
 0x107   : > { %v1015_v35 = vadd.f32 %v1014_v32, %v988_v33 }
 0x108   : > { %v929_v36 = vpop.f32.mrf.mxu0 }
 0x109   : > { %1167 = vst [vmem:[%s1660_s19 + $0x1] ss:$2 sm:$0xff] %v1015_v35  ;;  %v930_v37 = vadd.f32 %v929_v36, %v899_v34  ;;  %v960_v38 = vpop.f32.mrf.mxu1  ;;  %v991_v39 = vpop.f32.mrf.mxu2 }
 0x10a   : > { %v1018_v41 = vpop.f32.mrf.mxu3 }
 0x10b   : > { %v961_v40 = vadd.f32 %v960_v38, %v930_v37 }
 0x10d   : > { %v992_v42 = vadd.f32 %v991_v39, %v961_v40 }
 0x10f   : > { %v1019_v43 = vadd.f32 %v1018_v41, %v992_v42 }
 0x111   : > { %1168 = vst [vmem:[%s1660_s19 + $0x11] ss:$2 sm:$0xff] %v1019_v43 }
 0x112   : > { %1340 = shalt.err (!%p1337_p0)
}
 0x113   : > { %s1404_s30 = smov 128   ;;  %s1405_s5 = smov 8  }
 0x114   : > { %1182 = dma.vmem_to_hbm [thread:$0]  (%p1503_p5), %s1042_s15, 512, %s1044_s16, %s1026_s12, %s1404_s30, %s1404_s30, %s1405_s5  }
 0x115 PF: > { %s1058_s6 = sand.u32 1, %s1379_s9   ;;  %p1193_p3 = pnand %p1152_p11, %p1470_p6 }
 0x116   : > { %s1059_s17 = scalar_lea.sflag [#allocation4], %s1058_s6 }
 0x117   : > { %p1194_p7 = pneg %p1193_p3 }
 0x119   : > { %1374 = dma.done.wait (%p1194_p7), %s1059_s17, 512  }
 0x11a   : > { %1376 = vsyncadd (%p1194_p7), %s1059_s17, 4294966784  ;;  %s19_s14 = sadd.s32 1, %s1399_s14   ;;  %s1715_s9 = smov %s1383_s10 }
 0x11b   : > { %p16_p9 = scmp.ge.s32.totalorder %s19_s14, 4   ;;  %s1716_s10 = smov %s1387_s11 }
 0x11c   : > { %s1717_s11 = smov %s1512_s8  ;;  %s1718_s12 = smov %s1395_s13 }
 0x11d   : > { %s1719_s13 = smov %s1721_s29  ;;  %18 = sbr.rel (!%p16_p9) target bundleno = 7 (0x7), region = 85 }
 0x122   :  { %1065 = vsyncpa [#allocation3], 1 }
 0x123   :  { %1067 = vsyncpa [#allocation3 + $0x1], 1 }
 0x124   :  { %1068 = vsyncpa [#allocation6], 1 }
 0x125   :  { %1070 = vsyncpa [#allocation6 + $0x1], 1 }
 0x126   :  { %1071 = vsyncpa [#allocation4], 1 }
 0x127   :  { %1073 = vsyncpa [#allocation4 + $0x1], 1 }

// kernel: tpu_custom_call.1
= control target key start
LH: loop header
LB: loop body
LE: loop exit
PB: predicated region body
PF: predicated region fallthrough
CT: control target
= control target key end

     0   :  { %s2019_s0 = inlined_call_operand.hbm [shape: f32[2,16,32], index: 0, kind: input, shape index: {}]   ;;  %s2020_s1 = inlined_call_operand.hbm [shape: f32[2,4,16,16], index: 1, kind: input, shape index: {}]   ;;  %s2021_s2 = inlined_call_operand.hbm [shape: f32[2,1,32,32], index: 2, kind: output, shape index: {}]  }
   0x1   :  { %2028 = sst [smem:[#allocation15_spill]] %s2019_s0 }
   0x2   :  { %7 = vsyncpa [#allocation3], 0 }
   0x3   :  { %8 = vsyncpa [#allocation6], 0 }
   0x4   :  { %10 = vsyncpa [#allocation6 + $0x1], 0 }
   0x5   :  { %11 = vsyncpa [#allocation4], 0 }
   0x6   :  { %13 = vsyncpa [#allocation4 + $0x1], 0  ;;  %s1704_s9 = smov 0   ;;  %s1706_s10 = smov 0  }
   0x7   :  { %s1708_s11 = smov 0   ;;  %s1710_s12 = smov 0  }
   0x8   :  { %s1712_s13 = smov 0   ;;  %s1714_s14 = smov 0  }
   0x9   :  { %s1716_s15 = smov 0   ;;  %s1718_s16 = smov 0  }
   0xa LB: > { %2029 = sst [smem:[#allocation11_spill]] %s1652_s9  ;;  %s1386_s17 = sadd.s32 4294967295, %s1680_s16   ;;  %s1680_s16 = sphi %s1718_s16, %s19_s16   ;;  %s1676_s15 = sphi %s1716_s15, %s2053_s15   ;;  %s1672_s14 = sphi %s1714_s14, %s2052_s14   ;;  %s1668_s13 = sphi %s1712_s13, %s2051_s13   ;;  %s1664_s12 = sphi %s1710_s12, %s2050_s12   ;;  %s1660_s11 = sphi %s1708_s11, %s2049_s11   ;;  %s1656_s10 = sphi %s1706_s10, %s2048_s10   ;;  %s1652_s9 = sphi %s1704_s9, %s2047_s9  }
   0xb   : > { %s1387_s18 = sadd.s32 4294967294, %s1680_s16   ;;  %p83_p0 = scmp.ne.s32.totalorder %s1656_s10, %s1652_s9 }
   0xc   : > { %p1748_p1 = scmp.eq.s32.totalorder %s1386_s17, 0  ;;  %p1752_p2 = scmp.eq.s32.totalorder %s1386_s17, 3 }
   0xd   : > { %p117_p3 = scmp.eq.s32.totalorder %s1387_s18, 3  ;;  %p1388_p5 = scmp.ge.s32.totalorder %s1680_s16, 1 }
   0xe   : > { %p1758_p4 = por %p1748_p1, %p83_p0  ;;  %p124_p7 = scmp.lt.s32.totalorder %s1680_s16, 5 }
   0xf   : > { %p1763_p6 = por %p117_p3, %p83_p0  ;;  %s2035_s0 = sld [smem:[#allocation15_spill]] }
  0x10   : > { %p1771_p8 = pnand %p1388_p5, %p124_p7  ;;  %s1682_s27 = smov [#allocation2]  }
  0x11   : > { %s2033_s22 = scalar_select %p1763_p6, 1, 0 }
  0x12   : > { %p1431_p9 = pneg %p1771_p8  ;;  %s137_s28 = sshll.u32 %s1682_s27, 4  ;;  %s138_s28 = int_to_ptr.vmem [resolvable:$true] %s137_s28 }
  0x13   : > { %2034 = sst [smem:[#allocation12_spill]] %s2033_s22  ;;  %s2022_s29 = smov 128  }
  0x14   : > { %p1432_p10 = pnand %p1431_p9, %p1748_p1  ;;  %s2023_s30 = smov 8  }
  0x15   : > { %s135_s25 = sshll.u32 %s2035_s0, 4  ;;  %s34_s3 = sadd.s32 1, %s1672_s14  ;;  %s136_s25 = int_to_ptr.hbm [resolvable:$true] %s135_s25 }
  0x16   : > { %1434 = dma.hbm_to_vmem [thread:$0]  (!%p1432_p10), %s136_s25, 512, %s138_s28, [#allocation3], %s2022_s29, %s2022_s29, %s2023_s30  }
  0x17   : > { %p36_p11 = scmp.ge.s32.totalorder %s34_s3, 2  ;;  %s38_s4 = sadd.s32 1, %s1676_s15 }
  0x18   : > { %s70_s5 = sadd.s32 1, %s1660_s11  ;;  %p77_p12 = scmp.ne.s32.totalorder %s1660_s11, %s1656_s10 }
  0x19   : > { %s2055_s3 = smov (%p36_p11, %s34_s3), 0  ;;  %s2057_s4 = smov (!%p36_p11, %s38_s4), %s1676_s15 }
  0x1a   : > { %2037 = sst [smem:[#allocation13_spill]] %s2055_s3  ;;  %s64_s6 = ssub.s32 %s1672_s14, %s2055_s3 }
  0x1b   : > { %p78_p13 = scmp.eq.s32.totalorder %s1680_s16, 0  ;;  %p40_p0 = scmp.ge.s32.totalorder %s2057_s4, 2 }
  0x1c   : > { %p1795_p3 = por %p1752_p2, %p77_p12  ;;  %p1444_p7 = scmp.lt.s32.totalorder %s1680_s16, 4 }
  0x1d   : > { %p1799_p5 = por %p78_p13, %p77_p12  ;;  %s2059_s4 = smov (%p40_p0, %s2057_s4), 0 }
  0x1e   : > { %2040 = sst [smem:[#allocation14_spill]] %s2059_s4  ;;  %s151_s17 = sand.u32 1, %s1660_s11  }
  0x1f   : > { %s1392_s18 = sshll.u32 %s1676_s15, 3  ;;  %s63_s23 = ssub.s32 %s1676_s15, %s2059_s4 }
  0x20   : > { %s65_s24 = sor.u32 %s64_s6, %s63_s23  ;;  %s1391_s25 = sshll.u32 %s151_s17, 5 }
  0x21   : > { %p68_p9 = scmp.eq.s32.totalorder %s65_s24, 0  ;;  %s160_s20 = sadd.s32 %s1672_s14, %s1392_s18 }
  0x22   : > { %s155_s27 = scalar_lea.vmem [#allocation5], %s1391_s25  ;;  %s1393_s30 = sshll.u32 %s160_s20, 3 }
  0x23   : > { %s165_s28 = sshll.u32 %s155_s27, 4  ;;  %s162_s22 = scalar_lea.hbm %s2020_s1, %s1393_s30  ;;  %s166_s28 = int_to_ptr.vmem [resolvable:$true] %s165_s28 }
  0x24   : > { %s1812_s29 = scalar_select %p68_p9, %s1660_s11, %s70_s5  }
  0x25   : > { %p1436_p2 = pnand %p1444_p7, %p1799_p5  ;;  %s163_s9 = sshll.u32 %s162_s22, 4  ;;  %s164_s9 = int_to_ptr.hbm [resolvable:$true] %s163_s9 }
  0x26   : > { %s152_s4 = scalar_lea.sflag [#allocation6], %s151_s17  ;;  %s1685_s6 = smov 256  }
  0x27   : > { %s2041_s23 = smov 8   ;;  %s2042_s24 = smov 128  }
  0x28   : > { %1438 = dma.hbm_to_vmem [thread:$0]  (!%p1436_p2), %s164_s9, 512, %s166_s28, %s152_s4, %s1685_s6, %s2042_s24, %s2041_s23  }
  0x29   : > { %177 = sbr.rel (%p1771_p8) target bundleno = 425 (0x1a9), region = 28 }
  0x2e   : > { %1639 = dma.done.wait (%p1748_p1), [#allocation3], 512  }
  0x2f   : > { %1641 = vsyncadd (%p1748_p1), [#allocation3], 4294966784  ;;  %s1830_s0 = sand.u32 1, %s1656_s10  }
  0x30   : > { %s1396_s22 = sshll.u32 %s1830_s0, 5  ;;  %s185_s30 = scalar_lea.sflag [#allocation6], %s1830_s0 }
  0x31   : > { %s1834_s3 = scalar_lea.vmem [#allocation5], %s1396_s22 }
  0x32   : > { %1643 = dma.done.wait (%p1758_p4), %s185_s30, 512  }
  0x33   : > { %1645 = vsyncadd (%p1758_p4), %s185_s30, 4294966784  ;;  %vm224_vm0 = vcmask 130048   ;;  %v223_v0 = vld [vmem:[#allocation2 + $0x18] sm:$0xff]  ;;  %v222_v1 = vld [vmem:[#allocation2 + $0x10] sm:$0xff]  ;;  %vm891_vm2 = vcmask 64512   ;;  %s1418_s9 = sshll.u32 %s1664_s12, 1 }
  0x34   : > { %v1398_v2 = vld [vmem:[%s1834_s3 + $0x8] sm:$0xff]  ;;  %v1841_v3 = vand.u32 4294901760, %v223_v0  ;;  %v1843_v4 = vand.u32 4294901760, %v222_v1  ;;  %v217_v7 = vld [vmem:[#allocation2] sm:$0xff]  ;;  %v1402_v37 = vld [vmem:[%s1834_s3 + $0x18] sm:$0xff]  ;;  %s1419_s19 = sshll.u32 %s1668_s13, 2 }
  0x35   : > { %v226_v5 = vsel %vm224_vm0, %v1398_v2, 0  ;;  %v218_v6 = vld [vmem:[#allocation2 + $0x8] sm:$0xff]  ;;  %v1850_v10 = vand.u32 4294901760, %v217_v7  ;;  %v216_v11 = vld [vmem:[%s1834_s3] sm:$0xff]  ;;  %v561_v39 = vsel %vm224_vm0, %v1402_v37, 0  ;;  %v1401_v40 = vld [vmem:[%s1834_s3 + $0x10] sm:$0xff]  ;;  %s1274_s21 = sadd.s32 %s1419_s19, %s1418_s9 }
  0x36   : > { %v1846_v8 = vand.u32 4294901760, %v226_v5  ;;  %v1848_v9 = vand.u32 4294901760, %v218_v6  ;;  %v270_v12 = vsub.f32 %v223_v0, %v1841_v3  ;;  %243 = vmatpush.msra.mxu0 %v1841_v3  ;;  %v1856_v13 = vsub.f32 %v222_v1, %v1843_v4  ;;  %327 = vmatpush.msra.mxu3 %v1841_v3  ;;  %s1397_s26 = sshll.u32 %s1830_s0, 4  ;;  %s1420_s4 = sshll.u32 %s1274_s21, 3 }
  0x37   : > { %v388_v14 = vsel %vm224_vm0, %v216_v11, 0  ;;  %v1867_v18 = vsub.f32 %v217_v7, %v1850_v10  ;;  %v581_v41 = vand.u32 4294901760, %v561_v39  ;;  %v723_v42 = vsel %vm224_vm0, %v1401_v40, 0  ;;  %s1276_s12 = scalar_lea.hbm %s2021_s2, %s1420_s4  ;;  %s209_s13 = scalar_lea.vmem [#allocation7], %s1397_s26 }
  0x38   : > { %v247_v15 = vsub.f32 %v226_v5, %v1846_v8  ;;  %v1862_v16 = vsub.f32 %v218_v6, %v1848_v9  ;;  %v1864_v17 = vand.u32 4294901760, %v388_v14  ;;  %302 = vmatpush.msra.mxu2 %v270_v12  ;;  %245 = vmatpush.msra.mxu0 %v1843_v4  ;;  %v1870_v19 = vand.u32 4294901760, %v270_v12  ;;  %s1277_s17 = sshll.u32 %s209_s13, 4  ;;  %s1279_s18 = sshll.u32 %s1276_s12, 4  ;;  %s1278_s17 = int_to_ptr.vmem [resolvable:$true] %s1277_s17  ;;  %s1280_s18 = int_to_ptr.hbm [resolvable:$true] %s1279_s18 }
  0x39   : > { %v1873_v20 = vand.u32 4294901760, %v1856_v13  ;;  %329 = vmatpush.msra.mxu3 %v1843_v4  ;;  %v1883_v24 = vand.u32 4294901760, %v1867_v18  ;;  %v743_v43 = vand.u32 4294901760, %v723_v42  ;;  %v582_v44 = vsub.f32 %v561_v39, %v581_v41  ;;  %s1262_s25 = scalar_lea.sflag [#allocation4], %s1830_s0  ;;  %s1592_s20 = sshra.s32 %s1280_s18, 4  ;;  %s1593_s20 = int_to_ptr.hbm [resolvable:$true] %s1592_s20 }
  0x3a   : > { %v248_v21 = vand.u32 4294901760, %v247_v15  ;;  %v1877_v22 = vand.u32 4294901760, %v1862_v16  ;;  %v1880_v23 = vsub.f32 %v388_v14, %v1864_v17  ;;  %305 = vmatpush.msra.mxu2 %v1856_v13  ;;  %v272_v25 = vsub.f32 %v270_v12, %v1870_v19  ;;  %354 = vmatpush.msrb.mxu0 %v1870_v19  ;;  %s1594_s27 = scalar_lea.hbm %s1593_s20, 16  ;;  %s1598_s23 = scalar_lea.hbm %s2021_s2, 64 }
  0x3b   : > { %v278_v26 = vsub.f32 %v1856_v13, %v1873_v20  ;;  %308 = vmatmul.f32.vlgmr.msra.gmra.mxu2 %v247_v15  ;;  %v440_v30 = vsub.f32 %v1867_v18, %v1883_v24  ;;  %v583_v45 = vand.u32 4294901760, %v582_v44  ;;  %v744_v46 = vsub.f32 %v723_v42, %v743_v43  ;;  %p1595_p1 = scmp.ne.s32.totalorder %s1593_s20, %s1594_s27  ;;  %p1599_p10 = scmp.lt.s32.totalorder %s1593_s20, %s2021_s2 }
  0x3c   : > { %v249_v27 = vsub.f32 %v247_v15, %v248_v21  ;;  %333 = vmatmul.f32.vlgmr.msra.gmra.mxu3 %v248_v21  ;;  %v434_v28 = vsub.f32 %v1862_v16, %v1877_v22  ;;  %v410_v29 = vand.u32 4294901760, %v1880_v23  ;;  %v273_v31 = vand.u32 4294901760, %v272_v25  ;;  %405 = vmatpush.msrb.mxu2 %v1848_v9  ;;  %p1600_p11 = scmp.lt.s32.totalorder %s1598_s23, %s1594_s27 }
  0x3d   : > { %v279_v32 = vand.u32 4294901760, %v278_v26  ;;  %358 = vmatpush.msrb.mxu0 %v1873_v20  ;;  %v441_v36 = vand.u32 4294901760, %v440_v30  ;;  %v584_v47 = vsub.f32 %v582_v44, %v583_v45  ;;  %v745_v48 = vand.u32 4294901760, %v744_v46  ;;  %p1596_p4 = pnand %p1595_p1, %p1795_p3 }
  0x3e   : > { %v250_v33 = vand.u32 4294901760, %v249_v27  ;;  %v435_v34 = vand.u32 4294901760, %v434_v28  ;;  %v411_v35 = vsub.f32 %v1880_v23, %v410_v29  ;;  %274 = vmatpush.msra.mxu1 %v273_v31  ;;  %407 = vmatpush.msrb.mxu2 %v1850_v10  ;;  %v211_v1 = vlaneseq  ;;  %p1601_p12 = por %p1600_p11, %p1599_p10 }
  0x3f   : > { %v585_v49 = vand.u32 4294901760, %v584_v47  ;;  %v746_v50 = vsub.f32 %v744_v46, %v745_v48  ;;  %vm1258_vm6 = vcmask 261120   ;;  %p1597_p8 = pneg %p1596_p4 }
  0x40   : > { %251 = vmatmul.f32.vlgmr.msra.gmra.mxu0 %v250_v33  ;;  %436 = vmatpush.msrb.mxu3 %v435_v34  ;;  %v412_v38 = vand.u32 4294901760, %v411_v35 }
  0x41   : > { %280 = vmatpush.msra.mxu1 %v279_v32  ;;  %516 = vmatpush.msra.mxu2 %v1877_v22  ;;  %v747_v51 = vand.u32 4294901760, %v746_v50  ;;  %p1602_p13 = pnand %p1601_p12, %p1597_p8 }
  0x42   : > { %282 = vmatmul.f32.vlgmr.msra.gmra.mxu1 %v1846_v8  ;;  %442 = vmatpush.msrb.mxu3 %v441_v36 }
  0x43   : > { %379 = vmatpush.msrb.mxu1 %v1841_v3  ;;  %464 = vmatpush.msra.mxu0 %v1862_v16 }
  0x44   : > { %413 = vmatmul.f32.vlgmr.msrb.gmra.mxu2 %v412_v38  ;;  %444 = vmatmul.f32.vlgmr.msrb.gmra.mxu3 %v1864_v17 }
  0x45   : > { %381 = vmatpush.msrb.mxu1 %v1843_v4  ;;  %520 = vmatpush.msra.mxu2 %v1883_v24 }
  0x46   : > { %541 = vmatpush.msra.mxu3 %v1848_v9  ;;  %467 = vmatpush.msra.mxu0 %v1867_v18 }
  0x47   : > { %489 = vmatpush.msra.mxu1 %v1848_v9  ;;  %637 = vmatpush.msrb.mxu2 %v270_v12  ;;  %v212_v12 = vshrl.u32 %v211_v1, 7 }
  0x48   : > { %360 = vmatmul.f32.vlgmr.msrb.gmra.mxu0 %v1846_v8  ;;  %543 = vmatpush.msra.mxu3 %v1850_v10 }
  0x49   : > { %491 = vmatpush.msra.mxu1 %v1850_v10  ;;  %578 = vmatpush.msrb.mxu0 %v1841_v3  ;;  %v213_v25 = vadd.s32 8, %v212_v12 }
  0x4a   : > { %383 = vmatmul.f32.vlgmr.msrb.gmra.mxu1 %v1846_v8  ;;  %640 = vmatpush.msrb.mxu2 %v1856_v13 }
  0x4b   : > { %662 = vmatpush.msrb.mxu3 %v1841_v3  ;;  %580 = vmatpush.msrb.mxu0 %v1843_v4 }
  0x4c   : > { %522 = vmatmul.f32.vlgmr.msra.gmra.mxu2 %v1864_v17  ;;  %545 = vmatmul.f32.vlgmr.msra.gmra.mxu3 %v1864_v17 }
  0x4d   : > { %609 = vmatpush.msrb.mxu1 %v273_v31  ;;  %664 = vmatpush.msrb.mxu3 %v1843_v4 }
  0x4e   : > { %740 = vmatpush.msra.mxu2 %v1848_v9 }
  0x4f   : > { %771 = vmatpush.msra.mxu3 %v435_v34  ;;  %615 = vmatpush.msrb.mxu1 %v279_v32 }
  0x50   : > { %470 = vmatmul.f32.vlgmr.msra.gmra.mxu0 %v1880_v23  ;;  %742 = vmatpush.msra.mxu2 %v1850_v10 }
  0x51   : > { %689 = vmatpush.msra.mxu0 %v1870_v19  ;;  %777 = vmatpush.msra.mxu3 %v441_v36 }
  0x52   : > { %495 = vmatmul.f32.vlgmr.msra.gmra.mxu1 %v410_v29 }
  0x53   : > { %693 = vmatpush.msra.mxu0 %v1873_v20  ;;  %714 = vmatpush.msra.mxu1 %v1841_v3 }
  0x54   : > { %643 = vmatmul.f32.vlgmr.msrb.gmra.mxu2 %v582_v44  ;;  %668 = vmatmul.f32.vlgmr.msrb.gmra.mxu3 %v583_v45 }
  0x55   : > { %716 = vmatpush.msra.mxu1 %v1843_v4  ;;  %851 = vmatpush.msrb.mxu2 %v1877_v22  ;;  %v215_v4 = vand.u32 127, %v211_v1  ;;  %v1686_v22 = vmov 0.0  }
  0x56   : > { %876 = vmatpush.msrb.mxu3 %v1848_v9 }
  0x57   : > { %855 = vmatpush.msrb.mxu2 %v1883_v24 }
  0x58   : > { %586 = vmatmul.f32.vlgmr.msrb.gmra.mxu0 %v585_v49  ;;  %878 = vmatpush.msrb.mxu3 %v1850_v10 }
  0x59   : > { %799 = vmatpush.msrb.mxu0 %v1862_v16 }
  0x5a   : > { %617 = vmatmul.f32.vlgmr.msrb.gmra.mxu1 %v581_v41 }
  0x5b   : > { %802 = vmatpush.msrb.mxu0 %v1867_v18  ;;  %824 = vmatpush.msrb.mxu1 %v1848_v9 }
  0x5c   : > { %748 = vmatmul.f32.vlgmr.msra.gmra.mxu2 %v747_v51  ;;  %779 = vmatmul.f32.vlgmr.msra.gmra.mxu3 %v743_v43 }
  0x5d   : > { %826 = vmatpush.msrb.mxu1 %v1850_v10  ;;  %v1939_v10 = vmul.u32 2, %v215_v4 }
  0x5f   : > { %v884_v13 = vadd.s32 1, %v1939_v10  ;;  %vm550_vm4 = vcmp.eq.s32.totalorder %v212_v12, %v1939_v10  ;;  %vm551_vm5 = vcmp.eq.s32.totalorder %v213_v25, %v1939_v10 }
  0x60   : > { %695 = vmatmul.f32.vlgmr.msra.gmra.mxu0 %v581_v41 }
  0x61   : > { %vm885_vm1 = vcmp.eq.s32.totalorder %v212_v12, %v884_v13  ;;  %vm886_vm3 = vcmp.eq.s32.totalorder %v213_v25, %v884_v13 }
  0x62   : > { %718 = vmatmul.f32.vlgmr.msra.gmra.mxu1 %v581_v41  ;;  %v1942_v23 = vsel %vm885_vm1, 1.0, %v1686_v22  ;;  %v1946_v37 = vsel %vm886_vm3, 1.0, %v1686_v22 }
  0x63   : > { %v893_v28 = vsel %vm891_vm2, %v1942_v23, 0  ;;  %v896_v42 = vsel %vm891_vm2, %v1946_v37, 0 }
  0x64   : > { %857 = vmatmul.f32.vlgmr.msrb.gmra.mxu2 %v743_v43  ;;  %880 = vmatmul.f32.vlgmr.msrb.gmra.mxu3 %v743_v43  ;;  %v916_v34 = vsub.f32 %v893_v28, %v893_v28  ;;  %v924_v49 = vsub.f32 %v896_v42, %v896_v42 }
  0x66   : > { %v917_v40 = vand.u32 4294901760, %v916_v34 }
  0x68   : > { %805 = vmatmul.f32.vlgmr.msrb.gmra.mxu0 %v744_v46 }
  0x6a   : > { %830 = vmatmul.f32.vlgmr.msrb.gmra.mxu1 %v745_v48  ;;  %v918_v48 = vsub.f32 %v916_v34, %v917_v40 }
  0xbd   : > { %v252_v52 = vpop.f32.mrf.mxu0 }
  0xbe   : > { %v309_v54 = vpop.f32.mrf.mxu2 }
  0xbf   : > { %v283_v53 = vpop.f32.mrf.mxu1  ;;  %v334_v56 = vpop.f32.mrf.mxu3 }
  0xc0   : > { %v284_v55 = vadd.f32 %v283_v53, %v252_v52  ;;  %v919_v53 = vand.u32 4294901760, %v918_v48 }
  0xc2   : > { %v310_v57 = vadd.f32 %v309_v54, %v284_v55  ;;  %v925_v54 = vand.u32 4294901760, %v924_v49 }
  0xc4   : > { %v335_v58 = vadd.f32 %v334_v56, %v310_v57  ;;  %v1399_v56 = vsel %vm550_vm4, 1.0, %v1686_v22 }
  0xc5   : > { %v361_v59 = vpop.f32.mrf.mxu0 }
  0xc6   : > { %v362_v60 = vadd.f32 %v361_v59, %v335_v58  ;;  %v926_v59 = vsub.f32 %v924_v49, %v925_v54 }
  0xc7   : > { %v384_v61 = vpop.f32.mrf.mxu1  ;;  %v414_v62 = vpop.f32.mrf.mxu2 }
  0xc8   : > { %v385_v63 = vadd.f32 %v384_v61, %v362_v60  ;;  %v445_v0 = vpop.f32.mrf.mxu3  ;;  %v1076_v60 = vsel %vm891_vm2, %v1399_v56, 0 }
  0xca   : > { %v415_v2 = vadd.f32 %v414_v62, %v385_v63  ;;  %v1099_v63 = vsub.f32 %v1076_v60, %v1076_v60 }
  0xcc   : > { %v446_v3 = vadd.f32 %v445_v0, %v415_v2  ;;  %v927_v0 = vand.u32 4294901760, %v926_v59  ;;  %v1400_v2 = vsel %vm551_vm5, 1.0, %v1686_v22 }
  0xcd   : > { %v471_v5 = vpop.f32.mrf.mxu0  ;;  %v1079_v4 = vsel %vm891_vm2, %v1400_v2, 0 }
  0xce   : > { %v472_v6 = vadd.f32 %v471_v5, %v446_v3  ;;  %v1100_v3 = vand.u32 4294901760, %v1099_v63 }
  0xcf   : > { %v496_v7 = vpop.f32.mrf.mxu1  ;;  %v523_v8 = vpop.f32.mrf.mxu2 }
  0xd0   : > { %v546_v9 = vpop.f32.mrf.mxu3  ;;  %v497_v11 = vadd.f32 %v496_v7, %v472_v6  ;;  %v1101_v5 = vsub.f32 %v1099_v63, %v1100_v3  ;;  %v1107_v6 = vsub.f32 %v1079_v4, %v1079_v4 }
  0xd2   : > { %v524_v15 = vadd.f32 %v523_v8, %v497_v11  ;;  %v1102_v7 = vand.u32 4294901760, %v1101_v5  ;;  %v1108_v8 = vand.u32 4294901760, %v1107_v6 }
  0xd4   : > { %v547_v21 = vadd.f32 %v546_v9, %v524_v15  ;;  %v1109_v9 = vsub.f32 %v1107_v6, %v1108_v8 }
  0xd5   : > { %v587_v14 = vpop.f32.mrf.mxu0 }
  0xd6   : > { %v1096_v29 = vand.u32 4294901760, %v547_v21  ;;  %v1110_v10 = vand.u32 4294901760, %v1109_v9 }
  0xd7   : > { %v618_v16 = vpop.f32.mrf.mxu1  ;;  %v644_v17 = vpop.f32.mrf.mxu2 }
  0xd8   : > { %v619_v18 = vadd.f32 %v618_v16, %v587_v14  ;;  %v669_v19 = vpop.f32.mrf.mxu3  ;;  %v1131_v36 = vsub.f32 %v547_v21, %v1096_v29 }
  0xda   : > { %v645_v20 = vadd.f32 %v644_v17, %v619_v18  ;;  %v1132_v43 = vand.u32 4294901760, %v1131_v36 }
  0xdc   : > { %v670_v24 = vadd.f32 %v669_v19, %v645_v20  ;;  %v1133_v51 = vsub.f32 %v1131_v36, %v1132_v43 }
  0xdd   : > { %v696_v26 = vpop.f32.mrf.mxu0 }
  0xde   : > { %v697_v27 = vadd.f32 %v696_v26, %v670_v24  ;;  %v1134_v57 = vand.u32 4294901760, %v1133_v51 }
  0xdf   : > { %v719_v30 = vpop.f32.mrf.mxu1  ;;  %v749_v31 = vpop.f32.mrf.mxu2 }
  0xe0   : > { %v720_v32 = vadd.f32 %v719_v30, %v697_v27  ;;  %v780_v33 = vpop.f32.mrf.mxu3 }
  0xe2   : > { %v750_v35 = vadd.f32 %v749_v31, %v720_v32 }
  0xe4   : > { %v781_v38 = vadd.f32 %v780_v33, %v750_v35 }
  0xe5   : > { %v806_v39 = vpop.f32.mrf.mxu0 }
  0xe6   : > { %v807_v41 = vadd.f32 %v806_v39, %v781_v38 }
  0xe7   : > { %v831_v44 = vpop.f32.mrf.mxu1  ;;  %v858_v45 = vpop.f32.mrf.mxu2 }
  0xe8   : > { %v832_v46 = vadd.f32 %v831_v44, %v807_v41  ;;  %v881_v47 = vpop.f32.mrf.mxu3 }
  0xea   : > { %v859_v50 = vadd.f32 %v858_v45, %v832_v46 }
  0xec   : > { %v882_v52 = vadd.f32 %v881_v47, %v859_v50 }
  0xee   : > { %v913_v55 = vand.u32 4294901760, %v882_v52 }
  0xf0   : > { %v948_v58 = vsub.f32 %v882_v52, %v913_v55  ;;  %914 = vmatpush.msra.mxu0 %v913_v55  ;;  %1007 = vmatpush.msra.mxu3 %v913_v55 }
  0xf1   : > { %920 = vmatmul.f32.vlgmr.msra.gmra.mxu0 %v919_v53  ;;  %1011 = vmatmul.f32.vlgmr.msra.gmra.mxu3 %v917_v40 }
  0xf2   : > { %1135 = vmatpush.msrb.mxu3 %v1134_v57  ;;  %v949_v61 = vand.u32 4294901760, %v948_v58  ;;  %979 = vmatpush.msra.mxu2 %v948_v58 }
  0xf3   : > { %982 = vmatmul.f32.vlgmr.msra.gmra.mxu2 %v916_v34 }
  0xf4   : > { %1248 = vmatpush.msra.mxu3 %v1096_v29  ;;  %1097 = vmatpush.msrb.mxu2 %v1096_v29  ;;  %v950_v62 = vsub.f32 %v948_v58, %v949_v61 }
  0xf5   : > { %1039 = vmatpush.msrb.mxu0 %v949_v61 }
  0xf6   : > { %1222 = vmatpush.msra.mxu2 %v1132_v43  ;;  %v951_v1 = vand.u32 4294901760, %v950_v62 }
  0xf7   : > { %1162 = vmatpush.msra.mxu0 %v1131_v36 }
  0xf8   : > { %952 = vmatpush.msra.mxu1 %v951_v1 }
  0xf9   : > { %928 = vmatmul.f32.gmra.mxu0 %v927_v0  ;;  %1405 = vmatmul.msk.f32.vlgmr.msra.gmra.mxu1 %vm891_vm2, %v1942_v23 }
  0xfa   : > { %1065 = vmatpush.msrb.mxu1 %v913_v55  ;;  %1017 = vmatmul.f32.gmra.mxu3 %v925_v54 }
  0xfb   : > { %987 = vmatmul.f32.gmra.mxu2 %v924_v49 }
  0xfc   : > { %1190 = vmatpush.msra.mxu1 %v1096_v29 }
 0x101   : > { %1406 = vmatmul.msk.f32.gmra.mxu1 %vm891_vm2, %v1946_v37  ;;  %1407 = vmatmul.msk.f32.vlgmr.msrb.gmra.mxu0 %vm891_vm2, %v1942_v23 }
 0x102   : > { %1411 = vmatmul.msk.f32.vlgmr.msrb.gmra.mxu3 %vm891_vm2, %v1399_v56 }
 0x103   : > { %1103 = vmatmul.f32.vlgmr.msrb.gmra.mxu2 %v1102_v7 }
 0x109   : > { %1408 = vmatmul.msk.f32.gmra.mxu0 %vm891_vm2, %v1946_v37  ;;  %1409 = vmatmul.msk.f32.vlgmr.msrb.gmra.mxu1 %vm891_vm2, %v1942_v23 }
 0x10a   : > { %1412 = vmatmul.msk.f32.gmra.mxu3 %vm891_vm2, %v1400_v2 }
 0x10b   : > { %1111 = vmatmul.f32.gmra.mxu2 %v1110_v10 }
 0x111   : > { %1410 = vmatmul.msk.f32.gmra.mxu1 %vm891_vm2, %v1946_v37  ;;  %1165 = vmatmul.f32.vlgmr.msra.gmra.mxu0 %v1099_v63 }
 0x112   : > { %1415 = vmatmul.msk.f32.vlgmr.msra.gmra.mxu3 %vm891_vm2, %v1399_v56 }
 0x113   : > { %1413 = vmatmul.msk.f32.vlgmr.msra.gmra.mxu2 %vm891_vm2, %v1399_v56 }
 0x119   : > { %1170 = vmatmul.f32.gmra.mxu0 %v1107_v6  ;;  %1194 = vmatmul.f32.vlgmr.msra.gmra.mxu1 %v1100_v3 }
 0x11a   : > { %1416 = vmatmul.msk.f32.gmra.mxu3 %vm891_vm2, %v1400_v2 }
 0x11b   : > { %1414 = vmatmul.msk.f32.gmra.mxu2 %vm891_vm2, %v1400_v2 }
 0x121   : > { %1200 = vmatmul.f32.gmra.mxu1 %v1108_v8 }
 0x16e   : > { %v921_v11 = vpop.f32.mrf.mxu0 }
 0x174   : > { %v1012_v12 = vpop.f32.mrf.mxu3 }
 0x176   : > { %v929_v13 = vpop.f32.mrf.mxu0  ;;  %v955_v14 = vpop.f32.mrf.mxu1 }
 0x177   : > { %v983_v15 = vpop.f32.mrf.mxu2  ;;  %v956_v19 = vadd.f32 %v955_v14, %v921_v11 }
 0x179   : > { %v984_v21 = vadd.f32 %v983_v15, %v956_v19 }
 0x17b   : > { %v1013_v25 = vadd.f32 %v1012_v12, %v984_v21 }
 0x17d   : > { %v1018_v16 = vpop.f32.mrf.mxu3 }
 0x17e   : > { %v959_v17 = vpop.f32.mrf.mxu1  ;;  %v1042_v18 = vpop.f32.mrf.mxu0 }
 0x17f   : > { %v988_v20 = vpop.f32.mrf.mxu2  ;;  %v960_v26 = vadd.f32 %v959_v17, %v929_v13  ;;  %v1043_v28 = vadd.f32 %v1042_v18, %v1013_v25 }
 0x181   : > { %v989_v29 = vadd.f32 %v988_v20, %v960_v26 }
 0x183   : > { %v1019_v33 = vadd.f32 %v1018_v16, %v989_v29 }
 0x185   : > { %v1138_v22 = vpop.f32.mrf.mxu3 }
 0x186   : > { %v1046_v23 = vpop.f32.mrf.mxu0  ;;  %v1068_v24 = vpop.f32.mrf.mxu1 }
 0x187   : > { %v1104_v27 = vpop.f32.mrf.mxu2  ;;  %v1069_v30 = vadd.f32 %v1068_v24, %v1043_v28  ;;  %v1047_v37 = vadd.f32 %v1046_v23, %v1019_v33 }
 0x189   : > { %v1105_v34 = vadd.f32 %v1104_v27, %v1069_v30 }
 0x18b   : > { %v1139_v38 = vadd.f32 %v1138_v22, %v1105_v34 }
 0x18d   : > { %v1142_v31 = vpop.f32.mrf.mxu3 }
 0x18e   : > { %v1072_v32 = vpop.f32.mrf.mxu1  ;;  %v1166_v36 = vpop.f32.mrf.mxu0 }
 0x18f   : > { %v1112_v35 = vpop.f32.mrf.mxu2  ;;  %v1073_v39 = vadd.f32 %v1072_v32, %v1047_v37  ;;  %v1167_v40 = vadd.f32 %v1166_v36, %v1139_v38 }
 0x191   : > { %v1113_v43 = vadd.f32 %v1112_v35, %v1073_v39 }
 0x193   : > { %v1143_v48 = vadd.f32 %v1142_v31, %v1113_v43 }
 0x195   : > { %v1251_v42 = vpop.f32.mrf.mxu3 }
 0x196   : > { %v1195_v41 = vpop.f32.mrf.mxu1  ;;  %v1171_v47 = vpop.f32.mrf.mxu0 }
 0x197   : > { %v1196_v44 = vadd.f32 %v1195_v41, %v1167_v40  ;;  %v1225_v45 = vpop.f32.mrf.mxu2  ;;  %v1172_v50 = vadd.f32 %v1171_v47, %v1143_v48 }
 0x199   : > { %v1226_v46 = vadd.f32 %v1225_v45, %v1196_v44 }
 0x19b   : > { %v1252_v49 = vadd.f32 %v1251_v42, %v1226_v46 }
 0x19d   : > { %1259 = vst.msk [vmem:[%s209_s13] sm:$0xff] %vm1258_vm6, %v1252_v49  ;;  %v1255_v54 = vpop.f32.mrf.mxu3 }
 0x19e   : > { %v1201_v51 = vpop.f32.mrf.mxu1 }
 0x19f   : > { %v1202_v52 = vadd.f32 %v1201_v51, %v1172_v50  ;;  %v1229_v53 = vpop.f32.mrf.mxu2 }
 0x1a1   : > { %v1230_v55 = vadd.f32 %v1229_v53, %v1202_v52 }
 0x1a3   : > { %v1256_v56 = vadd.f32 %v1255_v54, %v1230_v55 }
 0x1a5   : > { %1260 = vst.msk [vmem:[%s209_s13 + $0x8] sm:$0xff] %vm1258_vm6, %v1256_v56 }
 0x1a6   : > { %1605 = shalt.err (!%p1602_p13)
}
 0x1a7   : > { %s1687_s0 = smov 128   ;;  %s1688_s30 = smov 8  }
 0x1a8   : > { %1429 = dma.vmem_to_hbm [thread:$0]  (%p1795_p3), %s1278_s17, 256, %s1280_s18, %s1262_s25, %s1687_s0, %s1687_s0, %s1688_s30  }
 0x1a9 PF: > { %s2043_s3 = sld [smem:[#allocation11_spill]]  ;;  %p1446_p0 = scmp.ge.s32.totalorder %s1680_s16, 2 }
 0x1ab   : > { %p1440_p5 = pnand %p1446_p0, %p1763_p6 }
 0x1ad   : > { %p1441_p7 = pneg %p1440_p5 }
 0x1af   : > { %s1294_s19 = sand.u32 1, %s2043_s3  }
 0x1b0   : > { %s1295_s21 = scalar_lea.sflag [#allocation4], %s1294_s19 }
 0x1b1   : > { %1647 = dma.done.wait (%p1441_p7), %s1295_s21, 256  }
 0x1b2   : > { %1649 = vsyncadd (%p1441_p7), %s1295_s21, 4294967040  ;;  %s19_s16 = sadd.s32 1, %s1680_s16   ;;  %s2045_s7 = sld [smem:[#allocation13_spill]] }
 0x1b3   : > { %p16_p9 = scmp.ge.s32.totalorder %s19_s16, 6   ;;  %s2046_s26 = sld [smem:[#allocation14_spill]] }
 0x1b4   : > { %s2047_s9 = smov %s1656_s10  ;;  %s2048_s10 = smov %s1660_s11 }
 0x1b5   : > { %s2049_s11 = smov %s1812_s29  ;;  %s2050_s12 = smov %s1672_s14 }
 0x1b6   : > { %s2051_s13 = smov %s1676_s15  ;;  %18 = sbr.rel (!%p16_p9) target bundleno = 10 (0xa), region = 82 }
 0x1b8   : > { %s2052_s14 = smov %s2045_s7 }
 0x1b9   : > { %s2053_s15 = smov %s2046_s26 }
 0x1bb   :  { %1301 = vsyncpa [#allocation3], 1 }
 0x1bc   :  { %1303 = vsyncpa [#allocation3 + $0x1], 1 }
 0x1bd   :  { %1304 = vsyncpa [#allocation6], 1 }
 0x1be   :  { %1306 = vsyncpa [#allocation6 + $0x1], 1 }
 0x1bf   :  { %1307 = vsyncpa [#allocation4], 1 }
 0x1c0   :  { %1309 = vsyncpa [#allocation4 + $0x1], 1 }

</bundles_post_ra>
